<compile_context>
chip_gen: v6e
topology: v6e:2x2x1
jax: 0.10.0
libtpu: 0.0.40
codegen_flags: <defaults>
</compile_context>

<pallas_src>
import math
import functools

import jax
import jax.numpy as jnp
import numpy as np
from jax import lax
from jax.experimental import pallas as pl
from jax.experimental.pallas import tpu as pltpu

MATMUL_DTYPE = jnp.bfloat16   # MXU operand dtype; accumulation is always f32.


# --------------------------------------------------------------------------
# Kernel 1: fused attention block  h = x + Wo @ MHA_RoPE(RMSNorm(x))
#   one grid step per batch row; all HBM I/O is [T, D] (lane-dense).
# --------------------------------------------------------------------------
def _attn_block_kernel(x_ref, nw_ref, wq_ref, wk_ref, wv_ref, wo_ref,
                       bq_ref, bk_ref, bv_ref, bo_ref, cos_ref, sin_ref,
                       o_ref, *, num_heads):
    x = x_ref[...].astype(jnp.float32)                       # [T, D]
    t, d = x.shape
    dh = d // num_heads
    hh = dh // 2

    # RMSNorm in f32, cast once to bf16 for the MXU.
    ms = jnp.mean(x * x, axis=-1, keepdims=True)
    hn = (x * lax.rsqrt(ms + 1e-6) * nw_ref[...]).astype(MATMUL_DTYPE)

    # Fused Q/K/V projections (bf16 x bf16 -> f32).
    q = jnp.dot(hn, wq_ref[...], preferred_element_type=jnp.float32) + bq_ref[...]
    k = jnp.dot(hn, wk_ref[...], preferred_element_type=jnp.float32) + bk_ref[...]
    v = jnp.dot(hn, wv_ref[...], preferred_element_type=jnp.float32) + bv_ref[...]

    cos = cos_ref[...]                                       # [T, Dh]
    sin = sin_ref[...]
    row = lax.broadcasted_iota(jnp.int32, (t, t), 0)
    col = lax.broadcasted_iota(jnp.int32, (t, t), 1)
    causal = col <= row
    scale = 1.0 / math.sqrt(dh)

    def rope(u):                                             # rotate-half RoPE
        u1 = u[:, :hh]
        u2 = u[:, hh:]
        return u * cos + jnp.concatenate([-u2, u1], axis=-1) * sin

    nt_dims = (((1,), (1,)), ((), ()))                       # q @ k^T, no transpose op
    outs = []
    for hidx in range(num_heads):                            # static unroll over heads
        sl = slice(hidx * dh, (hidx + 1) * dh)
        qh = rope(q[:, sl])
        kh = rope(k[:, sl])
        vh = v[:, sl]
        s = lax.dot_general(qh.astype(MATMUL_DTYPE), kh.astype(MATMUL_DTYPE),
                            nt_dims, preferred_element_type=jnp.float32) * scale
        s = jnp.where(causal, s, -jnp.inf)                   # causal mask (diag kept)
        s = s - jnp.max(s, axis=-1, keepdims=True)
        p = jnp.exp(s)                                       # softmax in f32 (EUP)
        p = p * pl.reciprocal(jnp.sum(p, axis=-1, keepdims=True), approx=True)
        outs.append(jnp.dot(p.astype(MATMUL_DTYPE), vh.astype(MATMUL_DTYPE),
                            preferred_element_type=jnp.float32))
    ao = jnp.concatenate(outs, axis=-1).astype(MATMUL_DTYPE)  # [T, D]

    proj = jnp.dot(ao, wo_ref[...], preferred_element_type=jnp.float32) + bo_ref[...]
    o_ref[...] = (x + proj).astype(o_ref.dtype)               # fused residual


# TODO(synk): for long sequence lengths replace the dense [T,T] score tile with
# a flash-style KV-tiled online-softmax loop (m/l/acc scratch in VMEM).
def attention_block(x_flat, bp, cos, sin, num_heads, seq_len):
    n, d = x_flat.shape
    b = n // seq_len
    dh = d // num_heads
    kern = functools.partial(_attn_block_kernel, num_heads=num_heads)

    def bcast(shape):
        return pl.BlockSpec(shape, lambda i, _s=len(shape): (0,) * _s)

    return pl.pallas_call(
        kern,
        out_shape=jax.ShapeDtypeStruct((n, d), jnp.float32),
        grid=(b,),
        in_specs=[
            pl.BlockSpec((seq_len, d), lambda i: (i, 0)),     # x rows of batch i
            bcast((1, d)),                                    # attn_norm_w
            bcast((d, d)), bcast((d, d)), bcast((d, d)), bcast((d, d)),  # wq wk wv wo
            bcast((1, d)), bcast((1, d)), bcast((1, d)), bcast((1, d)),  # bq bk bv bo
            bcast((seq_len, dh)), bcast((seq_len, dh)),       # cos, sin
        ],
        out_specs=pl.BlockSpec((seq_len, d), lambda i: (i, 0)),
        compiler_params=pltpu.CompilerParams(
            dimension_semantics=("parallel",)),
    )(x_flat,
      bp['attn_norm_w'].reshape(1, d),
      bp['wq'], bp['wk'], bp['wv'], bp['wo'],
      bp['bq'].reshape(1, d), bp['bk'].reshape(1, d),
      bp['bv'].reshape(1, d), bp['bo'].reshape(1, d),
      cos, sin)


# --------------------------------------------------------------------------
# Kernel 2: fused hash-MoE FFN block  out = h + MoE(RMSNorm(h), mapped)
#   grid = (row_tiles [parallel], experts [arbitrary, innermost]).
#   Per-expert token counts are scalar-prefetched -> empty experts skipped.
# --------------------------------------------------------------------------
def _moe_block_kernel(counts_ref, mapped_ref, h_ref, nw_ref,
                      w1_ref, b1_ref, w2_ref, b2_ref, o_ref, xn_ref):
    e = pl.program_id(1)

    @pl.when(e == 0)
    def _init():                                             # once per row tile
        hv = h_ref[...].astype(jnp.float32)
        ms = jnp.mean(hv * hv, axis=-1, keepdims=True)
        xn_ref[...] = (hv * lax.rsqrt(ms + 1e-6) * nw_ref[...]).astype(xn_ref.dtype)
        o_ref[...] = hv.astype(o_ref.dtype)                  # residual init

    @pl.when(counts_ref[e] > 0)                              # skip empty experts
    def _expert():
        mask = (mapped_ref[...] == e).astype(jnp.float32)    # [tm, 1] broadcast mask
        hid = jnp.dot(xn_ref[...], w1_ref[0],
                      preferred_element_type=jnp.float32) + b1_ref[0]
        hid = jnp.maximum(hid, 0.0) * mask                   # mask folded pre-2nd matmul
        y = jnp.dot(hid.astype(MATMUL_DTYPE), w2_ref[0],
                    preferred_element_type=jnp.float32)
        o_ref[...] += y + mask * b2_ref[0]


# TODO(synk): for large token counts, replace the masked dense expert sweep with
# grouped routing (XLA-side sort by expert + data-dependent index_map on group
# offsets via scalar prefetch) to cut MXU FLOPs and weight DMA by ~num_experts.
def moe_block(h_flat, mapped_2d, counts, bp):
    n, d = h_flat.shape
    e, _, hdim = bp['w1'].shape
    tm = 256 if n % 256 == 0 else (128 if n % 128 == 0 else n)
    grid = (n // tm, e)

    gs = pltpu.PrefetchScalarGridSpec(
        num_scalar_prefetch=1,
        grid=grid,
        in_specs=[
            pl.BlockSpec((tm, 1), lambda i, j, cnt: (i, 0)),       # mapped ids
            pl.BlockSpec((tm, d), lambda i, j, cnt: (i, 0)),       # h (residual in)
            pl.BlockSpec((1, d), lambda i, j, cnt: (0, 0)),        # ffn_norm_w
            pl.BlockSpec((1, d, hdim), lambda i, j, cnt: (j, 0, 0)),   # w1[e]
            pl.BlockSpec((1, 1, hdim), lambda i, j, cnt: (j, 0, 0)),   # b1[e]
            pl.BlockSpec((1, hdim, d), lambda i, j, cnt: (j, 0, 0)),   # w2[e]
            pl.BlockSpec((1, 1, d), lambda i, j, cnt: (j, 0, 0)),      # b2[e]
        ],
        out_specs=pl.BlockSpec((tm, d), lambda i, j, cnt: (i, 0)),
        scratch_shapes=[pltpu.VMEM((tm, d), MATMUL_DTYPE)],          # normed x, bf16
    )
    return pl.pallas_call(
        _moe_block_kernel,
        out_shape=jax.ShapeDtypeStruct((n, d), jnp.float32),
        grid_spec=gs,
        compiler_params=pltpu.CompilerParams(
            dimension_semantics=("parallel", "arbitrary")),
    )(counts, mapped_2d, h_flat,
      bp['ffn_norm_w'].reshape(1, d),
      bp['w1'], bp['b1'], bp['w2'], bp['b2'])


# --------------------------------------------------------------------------
# Kernel 3: tiled linear (vocab projection), f32 VMEM accumulator over K.
# --------------------------------------------------------------------------
def _linear_kernel(x_ref, w_ref, b_ref, o_ref, acc_ref):
    k = pl.program_id(2)

    @pl.when(k == 0)
    def _():
        acc_ref[...] = jnp.zeros_like(acc_ref)

    acc_ref[...] += jnp.dot(x_ref[...], w_ref[...],
                            preferred_element_type=jnp.float32)

    @pl.when(k == pl.num_programs(2) - 1)
    def _():
        o_ref[...] = (acc_ref[...] + b_ref[...]).astype(o_ref.dtype)


def _pick_tile(dim, tile):
    return tile if dim % tile == 0 else dim


def linear_tiled(x, w, b, *, tm=256, tn=256, tk=512):
    m, kd = x.shape
    n = w.shape[1]
    tm = _pick_tile(m, tm)
    tn = _pick_tile(n, tn)
    tk = _pick_tile(kd, tk)
    grid = (m // tm, n // tn, kd // tk)
    return pl.pallas_call(
        _linear_kernel,
        out_shape=jax.ShapeDtypeStruct((m, n), jnp.float32),
        grid=grid,
        in_specs=[
            pl.BlockSpec((tm, tk), lambda i, j, k: (i, k)),
            pl.BlockSpec((tk, tn), lambda i, j, k: (k, j)),
            pl.BlockSpec((1, tn), lambda i, j, k: (0, j)),
        ],
        out_specs=pl.BlockSpec((tm, tn), lambda i, j, k: (i, j)),
        scratch_shapes=[pltpu.VMEM((tm, tn), jnp.float32)],
        compiler_params=pltpu.CompilerParams(
            dimension_semantics=("parallel", "parallel", "arbitrary")),
    )(x, w, b.reshape(1, n))


# ------------------------------ model wrapper ------------------------------
def rope_tables(t, dh):
    inv_freq = 1.0 / (10000.0 ** (jnp.arange(0, dh, 2, dtype=jnp.float32) / dh))
    ang = jnp.arange(t, dtype=jnp.float32)[:, None] * inv_freq[None, :]
    cos = jnp.concatenate([jnp.cos(ang), jnp.cos(ang)], axis=-1)
    sin = jnp.concatenate([jnp.sin(ang), jnp.sin(ang)], axis=-1)
    return cos, sin


def forward(params, tokens, num_heads):
    mapped = params['hash_map'][tokens]            # [B, T] expert ids (XLA gather)
    x = params['embed'][tokens]                    # [B, T, D] embedding (XLA gather)
    b, t, d = x.shape
    dh = d // num_heads
    num_experts = params['blocks'][0]['w1'].shape[0]

    x_flat = x.reshape(b * t, d)
    mapped_flat = mapped.reshape(b * t).astype(jnp.int32)
    mapped_2d = mapped_flat.reshape(b * t, 1)
    counts = jnp.sum(mapped_flat[:, None] == jnp.arange(num_experts)[None, :],
                     axis=0).astype(jnp.int32)     # per-expert token counts (SMEM prefetch)
    cos, sin = rope_tables(t, dh)

    for bp in params['blocks']:
        h = attention_block(x_flat, bp, cos, sin, num_heads, t)
        x_flat = moe_block(h, mapped_2d, counts, bp)

    logits = linear_tiled(x_flat.astype(MATMUL_DTYPE),
                          params['out_w'], params['out_b'])
    return logits.reshape(b, t, -1)


# ----------------------------- parameter init ------------------------------
def xavier(key, shape):
    fan_in, fan_out = shape[-2], shape[-1]
    limit = math.sqrt(6.0 / (fan_in + fan_out))
    return jax.random.uniform(key, shape, jnp.float32, -limit, limit)


def init_params(key, vocab, dim, num_heads, num_layers, num_experts):
    hidden = 4 * dim
    keys = jax.random.split(key, 3 + 6 * num_layers)
    params = {
        'embed': xavier(keys[0], (vocab, dim)),
        'out_w': xavier(keys[1], (dim, vocab)).astype(MATMUL_DTYPE),
        'out_b': jnp.zeros((vocab,), jnp.float32),
        'hash_map': jax.random.randint(keys[2], (vocab,), 0, num_experts,
                                       dtype=jnp.int32),
        'blocks': [],
    }
    for l in range(num_layers):
        kq, kk, kv, ko, k1, k2 = keys[3 + 6 * l: 3 + 6 * (l + 1)]
        params['blocks'].append({
            'attn_norm_w': jnp.ones((dim,), jnp.float32),
            'wq': xavier(kq, (dim, dim)).astype(MATMUL_DTYPE),
            'wk': xavier(kk, (dim, dim)).astype(MATMUL_DTYPE),
            'wv': xavier(kv, (dim, dim)).astype(MATMUL_DTYPE),
            'wo': xavier(ko, (dim, dim)).astype(MATMUL_DTYPE),
            'bq': jnp.zeros((dim,), jnp.float32),
            'bk': jnp.zeros((dim,), jnp.float32),
            'bv': jnp.zeros((dim,), jnp.float32),
            'bo': jnp.zeros((dim,), jnp.float32),
            'ffn_norm_w': jnp.ones((dim,), jnp.float32),
            'w1': xavier(k1, (num_experts, dim, hidden)).astype(MATMUL_DTYPE),
            'b1': jnp.zeros((num_experts, 1, hidden), jnp.float32),
            'w2': xavier(k2, (num_experts, hidden, dim)).astype(MATMUL_DTYPE),
            'b2': jnp.zeros((num_experts, 1, dim), jnp.float32),
        })
    return params


# ------------------------- pure-JAX reference check ------------------------
def reference_forward(params, tokens, num_heads):
    f32 = jnp.float32
    bf = lambda u: u.astype(MATMUL_DTYPE)
    mapped = params['hash_map'][tokens]
    x = params['embed'][tokens]
    b, t, d = x.shape
    dh = d // num_heads
    hh = dh // 2
    cos, sin = rope_tables(t, dh)

    def rms(v, w):
        return v * lax.rsqrt(jnp.mean(v * v, -1, keepdims=True) + 1e-6) * w

    def rope(u):                                # [b, nh, t, dh]
        u1, u2 = u[..., :hh], u[..., hh:]
        return u * cos + jnp.concatenate([-u2, u1], -1) * sin

    for bp in params['blocks']:
        hn = rms(x, bp['attn_norm_w'])
        q = jnp.einsum('btd,de->bte', bf(hn), bp['wq'],
                       preferred_element_type=f32) + bp['bq']
        k = jnp.einsum('btd,de->bte', bf(hn), bp['wk'],
                       preferred_element_type=f32) + bp['bk']
        v = jnp.einsum('btd,de->bte', bf(hn), bp['wv'],
                       preferred_element_type=f32) + bp['bv']
        q = jnp.transpose(q.reshape(b, t, num_heads, dh), (0, 2, 1, 3))
        k = jnp.transpose(k.reshape(b, t, num_heads, dh), (0, 2, 1, 3))
        v = jnp.transpose(v.reshape(b, t, num_heads, dh), (0, 2, 1, 3))
        q, k = rope(q), rope(k)
        s = jnp.einsum('bhqd,bhkd->bhqk', bf(q), bf(k),
                       preferred_element_type=f32) / math.sqrt(dh)
        mask = jnp.tril(jnp.ones((t, t), bool))
        s = jnp.where(mask, s, -jnp.inf)
        p = jax.nn.softmax(s, axis=-1)
        ao = jnp.einsum('bhqk,bhkd->bhqd', bf(p), bf(v),
                        preferred_element_type=f32)
        ao = jnp.transpose(ao, (0, 2, 1, 3)).reshape(b, t, d)
        ao = jnp.einsum('btd,de->bte', bf(ao), bp['wo'],
                        preferred_element_type=f32) + bp['bo']
        h = x + ao

        fn = bf(rms(h, bp['ffn_norm_w']))
        w1 = bp['w1'][mapped]
        b1 = bp['b1'][mapped][:, :, 0]
        w2 = bp['w2'][mapped]
        b2 = bp['b2'][mapped][:, :, 0]
        hid = jnp.maximum(jnp.einsum('btd,btdh->bth', fn, w1,
                                     preferred_element_type=f32) + b1, 0.0)
        mo = jnp.einsum('bth,bthd->btd', bf(hid), w2,
                        preferred_element_type=f32) + b2
        x = h + mo
    return jnp.einsum('btd,dv->btv', bf(x), params['out_w'],
                      preferred_element_type=f32) + params['out_b']


# TODO(synk): generate() (host-side autoregressive sampling with a tokenizer /
# sampler object) is a Python driver loop, not kernel work — not translated.

# ---------------------------------- main -----------------------------------
if __name__ == "__main__":
    VOCAB = 64
    DIM = 32
    NUM_HEADS = 4
    NUM_LAYERS = 2
    NUM_EXPERTS = 4
    B, T = 2, 8            # T <= cntx

    key = jax.random.PRNGKey(0)
    kparam, ktok = jax.random.split(key)
    params = init_params(kparam, VOCAB, DIM, NUM_HEADS, NUM_LAYERS, NUM_EXPERTS)
    tokens = jax.random.randint(ktok, (B, T), 0, VOCAB, dtype=jnp.int32)

    fwd = jax.jit(functools.partial(forward, num_heads=NUM_HEADS))
    logits = fwd(params, tokens)
    jax.block_until_ready(logits)

    ref = reference_forward(params, tokens, NUM_HEADS)
    np.testing.assert_allclose(np.asarray(logits), np.asarray(ref),
                               rtol=2e-2, atol=2e-2)
    assert logits.shape == (B, T, VOCAB)
    print("KERNEL_OK")
</pallas_src>

<mosaic_0001>
module attributes {stable_mosaic.version = 11 : i64} {
  func.func @_attn_block_kernel(%arg0: i32, %arg1: memref<8x32xf32, #tpu.memory_space<vmem>>, %arg2: memref<1x32xf32, #tpu.memory_space<vmem>>, %arg3: memref<32x32xbf16, #tpu.memory_space<vmem>>, %arg4: memref<32x32xbf16, #tpu.memory_space<vmem>>, %arg5: memref<32x32xbf16, #tpu.memory_space<vmem>>, %arg6: memref<32x32xbf16, #tpu.memory_space<vmem>>, %arg7: memref<1x32xf32, #tpu.memory_space<vmem>>, %arg8: memref<1x32xf32, #tpu.memory_space<vmem>>, %arg9: memref<1x32xf32, #tpu.memory_space<vmem>>, %arg10: memref<1x32xf32, #tpu.memory_space<vmem>>, %arg11: memref<8x8xf32, #tpu.memory_space<vmem>>, %arg12: memref<8x8xf32, #tpu.memory_space<vmem>>, %arg13: memref<8x32xf32, #tpu.memory_space<vmem>>) attributes {dimension_semantics = [#tpu.dimension_semantics<parallel>], iteration_bounds = array<i64: 2>, scalar_prefetch = 0 : i64, scratch_operands = 0 : i64, tpu.core_type = #tpu.core_type<tc>, window_params = [{transform_indices = @transform_0, window_bounds = array<i64: 8, 32>}, {pipeline_mode = #tpu.pipeline_mode<synchronous>, transform_indices = @transform_1, window_bounds = array<i64: 1, 32>}, {pipeline_mode = #tpu.pipeline_mode<synchronous>, transform_indices = @transform_2, window_bounds = array<i64: 32, 32>}, {pipeline_mode = #tpu.pipeline_mode<synchronous>, transform_indices = @transform_3, window_bounds = array<i64: 32, 32>}, {pipeline_mode = #tpu.pipeline_mode<synchronous>, transform_indices = @transform_4, window_bounds = array<i64: 32, 32>}, {pipeline_mode = #tpu.pipeline_mode<synchronous>, transform_indices = @transform_5, window_bounds = array<i64: 32, 32>}, {pipeline_mode = #tpu.pipeline_mode<synchronous>, transform_indices = @transform_6, window_bounds = array<i64: 1, 32>}, {pipeline_mode = #tpu.pipeline_mode<synchronous>, transform_indices = @transform_7, window_bounds = array<i64: 1, 32>}, {pipeline_mode = #tpu.pipeline_mode<synchronous>, transform_indices = @transform_8, window_bounds = array<i64: 1, 32>}, {pipeline_mode = #tpu.pipeline_mode<synchronous>, transform_indices = @transform_9, window_bounds = array<i64: 1, 32>}, {pipeline_mode = #tpu.pipeline_mode<synchronous>, transform_indices = @transform_10, window_bounds = array<i64: 8, 8>}, {pipeline_mode = #tpu.pipeline_mode<synchronous>, transform_indices = @transform_11, window_bounds = array<i64: 8, 8>}, {transform_indices = @transform_12, window_bounds = array<i64: 8, 32>}]} {
    %c0 = arith.constant 0 : index
    %c0_0 = arith.constant 0 : index
    %0 = vector.load %arg1[%c0, %c0_0] : memref<8x32xf32, #tpu.memory_space<vmem>>, vector<8x32xf32>
    %1 = arith.mulf %0, %0 : vector<8x32xf32>
    %cst = arith.constant dense<0.000000e+00> : vector<8xf32>
    %2 = vector.multi_reduction <add>, %1, %cst [1] : vector<8x32xf32> to vector<8xf32>
    %3 = vector.shape_cast %2 : vector<8xf32> to vector<8x1xf32>
    %cst_1 = arith.constant 3.200000e+01 : f32
    %4 = vector.broadcast %cst_1 : f32 to vector<8x1xf32>
    %5 = arith.divf %3, %4 : vector<8x1xf32>
    %cst_2 = arith.constant 9.99999997E-7 : f32
    %6 = vector.broadcast %cst_2 : f32 to vector<8x1xf32>
    %7 = arith.addf %5, %6 : vector<8x1xf32>
    %8 = math.rsqrt %7 : vector<8x1xf32>
    %9 = vector.broadcast %8 : vector<8x1xf32> to vector<8x32xf32>
    %10 = arith.mulf %0, %9 : vector<8x32xf32>
    %c0_3 = arith.constant 0 : index
    %c0_4 = arith.constant 0 : index
    %11 = vector.load %arg2[%c0_3, %c0_4] : memref<1x32xf32, #tpu.memory_space<vmem>>, vector<1x32xf32>
    %12 = vector.broadcast %11 : vector<1x32xf32> to vector<8x32xf32>
    %13 = arith.mulf %10, %12 : vector<8x32xf32>
    %14 = arith.truncf %13 : vector<8x32xf32> to vector<8x32xbf16>
    %c0_5 = arith.constant 0 : index
    %c0_6 = arith.constant 0 : index
    %15 = vector.load %arg3[%c0_5, %c0_6] : memref<32x32xbf16, #tpu.memory_space<vmem>>, vector<32x32xbf16>
    %cst_7 = arith.constant dense<0.000000e+00> : vector<8x32xf32>
    %16 = tpu.matmul %14, %15, %cst_7 {dimension_numbers = #tpu.dot_dimension_numbers<[1], [0], [0], [1], [0, 0, 1, 1], [], []>} : vector<8x32xbf16>, vector<32x32xbf16>, vector<8x32xf32> -> vector<8x32xf32>
    %c0_8 = arith.constant 0 : index
    %c0_9 = arith.constant 0 : index
    %17 = vector.load %arg7[%c0_8, %c0_9] : memref<1x32xf32, #tpu.memory_space<vmem>>, vector<1x32xf32>
    %18 = vector.broadcast %17 : vector<1x32xf32> to vector<8x32xf32>
    %19 = arith.addf %16, %18 : vector<8x32xf32>
    %c0_10 = arith.constant 0 : index
    %c0_11 = arith.constant 0 : index
    %20 = vector.load %arg4[%c0_10, %c0_11] : memref<32x32xbf16, #tpu.memory_space<vmem>>, vector<32x32xbf16>
    %cst_12 = arith.constant dense<0.000000e+00> : vector<8x32xf32>
    %21 = tpu.matmul %14, %20, %cst_12 {dimension_numbers = #tpu.dot_dimension_numbers<[1], [0], [0], [1], [0, 0, 1, 1], [], []>} : vector<8x32xbf16>, vector<32x32xbf16>, vector<8x32xf32> -> vector<8x32xf32>
    %c0_13 = arith.constant 0 : index
    %c0_14 = arith.constant 0 : index
    %22 = vector.load %arg8[%c0_13, %c0_14] : memref<1x32xf32, #tpu.memory_space<vmem>>, vector<1x32xf32>
    %23 = vector.broadcast %22 : vector<1x32xf32> to vector<8x32xf32>
    %24 = arith.addf %21, %23 : vector<8x32xf32>
    %c0_15 = arith.constant 0 : index
    %c0_16 = arith.constant 0 : index
    %25 = vector.load %arg5[%c0_15, %c0_16] : memref<32x32xbf16, #tpu.memory_space<vmem>>, vector<32x32xbf16>
    %cst_17 = arith.constant dense<0.000000e+00> : vector<8x32xf32>
    %26 = tpu.matmul %14, %25, %cst_17 {dimension_numbers = #tpu.dot_dimension_numbers<[1], [0], [0], [1], [0, 0, 1, 1], [], []>} : vector<8x32xbf16>, vector<32x32xbf16>, vector<8x32xf32> -> vector<8x32xf32>
    %c0_18 = arith.constant 0 : index
    %c0_19 = arith.constant 0 : index
    %27 = vector.load %arg9[%c0_18, %c0_19] : memref<1x32xf32, #tpu.memory_space<vmem>>, vector<1x32xf32>
    %28 = vector.broadcast %27 : vector<1x32xf32> to vector<8x32xf32>
    %29 = arith.addf %26, %28 : vector<8x32xf32>
    %c0_20 = arith.constant 0 : index
    %c0_21 = arith.constant 0 : index
    %30 = vector.load %arg11[%c0_20, %c0_21] : memref<8x8xf32, #tpu.memory_space<vmem>>, vector<8x8xf32>
    %c0_22 = arith.constant 0 : index
    %c0_23 = arith.constant 0 : index
    %31 = vector.load %arg12[%c0_22, %c0_23] : memref<8x8xf32, #tpu.memory_space<vmem>>, vector<8x8xf32>
    %32 = tpu.iota {dimensions = array<i32: 0>} : vector<8x8xi32>
    %33 = tpu.iota {dimensions = array<i32: 1>} : vector<8x8xi32>
    %34 = arith.cmpi sle, %33, %32 : vector<8x8xi32>
    %35 = vector.extract_strided_slice %19 {offsets = [0, 0], sizes = [8, 8], strides = [1, 1]} : vector<8x32xf32> to vector<8x8xf32>
    %36 = vector.extract_strided_slice %35 {offsets = [0, 0], sizes = [8, 4], strides = [1, 1]} : vector<8x8xf32> to vector<8x4xf32>
    %37 = vector.extract_strided_slice %35 {offsets = [0, 4], sizes = [8, 4], strides = [1, 1]} : vector<8x8xf32> to vector<8x4xf32>
    %38 = arith.mulf %35, %30 : vector<8x8xf32>
    %cst_24 = arith.constant 0.000000e+00 : f32
    %39 = vector.broadcast %cst_24 : f32 to vector<8x4xf32>
    %40 = arith.subf %39, %37 : vector<8x4xf32>
    %41 = tpu.concatenate %40, %36 in 1 : vector<8x4xf32>, vector<8x4xf32> -> vector<8x8xf32>
    %42 = arith.mulf %41, %31 : vector<8x8xf32>
    %43 = arith.addf %38, %42 : vector<8x8xf32>
    %44 = vector.extract_strided_slice %24 {offsets = [0, 0], sizes = [8, 8], strides = [1, 1]} : vector<8x32xf32> to vector<8x8xf32>
    %45 = vector.extract_strided_slice %44 {offsets = [0, 0], sizes = [8, 4], strides = [1, 1]} : vector<8x8xf32> to vector<8x4xf32>
    %46 = vector.extract_strided_slice %44 {offsets = [0, 4], sizes = [8, 4], strides = [1, 1]} : vector<8x8xf32> to vector<8x4xf32>
    %47 = arith.mulf %44, %30 : vector<8x8xf32>
    %cst_25 = arith.constant 0.000000e+00 : f32
    %48 = vector.broadcast %cst_25 : f32 to vector<8x4xf32>
    %49 = arith.subf %48, %46 : vector<8x4xf32>
    %50 = tpu.concatenate %49, %45 in 1 : vector<8x4xf32>, vector<8x4xf32> -> vector<8x8xf32>
    %51 = arith.mulf %50, %31 : vector<8x8xf32>
    %52 = arith.addf %47, %51 : vector<8x8xf32>
    %53 = vector.extract_strided_slice %29 {offsets = [0, 0], sizes = [8, 8], strides = [1, 1]} : vector<8x32xf32> to vector<8x8xf32>
    %54 = arith.truncf %43 : vector<8x8xf32> to vector<8x8xbf16>
    %55 = arith.truncf %52 : vector<8x8xf32> to vector<8x8xbf16>
    %cst_26 = arith.constant dense<0.000000e+00> : vector<8x8xf32>
    %56 = tpu.matmul %54, %55, %cst_26 {dimension_numbers = #tpu.dot_dimension_numbers<[1], [1], [0], [0], [0, 0, 1, 0], [], []>} : vector<8x8xbf16>, vector<8x8xbf16>, vector<8x8xf32> -> vector<8x8xf32>
    %cst_27 = arith.constant 0.353553385 : f32
    %57 = vector.broadcast %cst_27 : f32 to vector<8x8xf32>
    %58 = arith.mulf %56, %57 : vector<8x8xf32>
    %cst_28 = arith.constant 0xFF800000 : f32
    %59 = vector.broadcast %cst_28 : f32 to vector<8x8xf32>
    %60 = arith.select %34, %58, %59 : vector<8x8xi1>, vector<8x8xf32>
    %cst_29 = arith.constant dense<0xFF800000> : vector<8xf32>
    %61 = vector.multi_reduction <maximumf>, %60, %cst_29 [1] : vector<8x8xf32> to vector<8xf32>
    %62 = vector.shape_cast %61 : vector<8xf32> to vector<8x1xf32>
    %63 = vector.broadcast %62 : vector<8x1xf32> to vector<8x8xf32>
    %64 = arith.subf %60, %63 : vector<8x8xf32>
    %65 = math.exp %64 : vector<8x8xf32>
    %cst_30 = arith.constant dense<0.000000e+00> : vector<8xf32>
    %66 = vector.multi_reduction <add>, %65, %cst_30 [1] : vector<8x8xf32> to vector<8xf32>
    %67 = vector.shape_cast %66 : vector<8xf32> to vector<8x1xf32>
    %68 = tpu.reciprocal %67 {approx = true} : vector<8x1xf32> -> vector<8x1xf32>
    %69 = vector.broadcast %68 : vector<8x1xf32> to vector<8x8xf32>
    %70 = arith.mulf %65, %69 : vector<8x8xf32>
    %71 = arith.truncf %70 : vector<8x8xf32> to vector<8x8xbf16>
    %72 = arith.truncf %53 : vector<8x8xf32> to vector<8x8xbf16>
    %cst_31 = arith.constant dense<0.000000e+00> : vector<8x8xf32>
    %73 = tpu.matmul %71, %72, %cst_31 {dimension_numbers = #tpu.dot_dimension_numbers<[1], [0], [0], [1], [0, 0, 1, 1], [], []>} : vector<8x8xbf16>, vector<8x8xbf16>, vector<8x8xf32> -> vector<8x8xf32>
    %74 = vector.extract_strided_slice %19 {offsets = [0, 8], sizes = [8, 8], strides = [1, 1]} : vector<8x32xf32> to vector<8x8xf32>
    %75 = vector.extract_strided_slice %74 {offsets = [0, 0], sizes = [8, 4], strides = [1, 1]} : vector<8x8xf32> to vector<8x4xf32>
    %76 = vector.extract_strided_slice %74 {offsets = [0, 4], sizes = [8, 4], strides = [1, 1]} : vector<8x8xf32> to vector<8x4xf32>
    %77 = arith.mulf %74, %30 : vector<8x8xf32>
    %cst_32 = arith.constant 0.000000e+00 : f32
    %78 = vector.broadcast %cst_32 : f32 to vector<8x4xf32>
    %79 = arith.subf %78, %76 : vector<8x4xf32>
    %80 = tpu.concatenate %79, %75 in 1 : vector<8x4xf32>, vector<8x4xf32> -> vector<8x8xf32>
    %81 = arith.mulf %80, %31 : vector<8x8xf32>
    %82 = arith.addf %77, %81 : vector<8x8xf32>
    %83 = vector.extract_strided_slice %24 {offsets = [0, 8], sizes = [8, 8], strides = [1, 1]} : vector<8x32xf32> to vector<8x8xf32>
    %84 = vector.extract_strided_slice %83 {offsets = [0, 0], sizes = [8, 4], strides = [1, 1]} : vector<8x8xf32> to vector<8x4xf32>
    %85 = vector.extract_strided_slice %83 {offsets = [0, 4], sizes = [8, 4], strides = [1, 1]} : vector<8x8xf32> to vector<8x4xf32>
    %86 = arith.mulf %83, %30 : vector<8x8xf32>
    %cst_33 = arith.constant 0.000000e+00 : f32
    %87 = vector.broadcast %cst_33 : f32 to vector<8x4xf32>
    %88 = arith.subf %87, %85 : vector<8x4xf32>
    %89 = tpu.concatenate %88, %84 in 1 : vector<8x4xf32>, vector<8x4xf32> -> vector<8x8xf32>
    %90 = arith.mulf %89, %31 : vector<8x8xf32>
    %91 = arith.addf %86, %90 : vector<8x8xf32>
    %92 = vector.extract_strided_slice %29 {offsets = [0, 8], sizes = [8, 8], strides = [1, 1]} : vector<8x32xf32> to vector<8x8xf32>
    %93 = arith.truncf %82 : vector<8x8xf32> to vector<8x8xbf16>
    %94 = arith.truncf %91 : vector<8x8xf32> to vector<8x8xbf16>
    %cst_34 = arith.constant dense<0.000000e+00> : vector<8x8xf32>
    %95 = tpu.matmul %93, %94, %cst_34 {dimension_numbers = #tpu.dot_dimension_numbers<[1], [1], [0], [0], [0, 0, 1, 0], [], []>} : vector<8x8xbf16>, vector<8x8xbf16>, vector<8x8xf32> -> vector<8x8xf32>
    %cst_35 = arith.constant 0.353553385 : f32
    %96 = vector.broadcast %cst_35 : f32 to vector<8x8xf32>
    %97 = arith.mulf %95, %96 : vector<8x8xf32>
    %cst_36 = arith.constant 0xFF800000 : f32
    %98 = vector.broadcast %cst_36 : f32 to vector<8x8xf32>
    %99 = arith.select %34, %97, %98 : vector<8x8xi1>, vector<8x8xf32>
    %cst_37 = arith.constant dense<0xFF800000> : vector<8xf32>
    %100 = vector.multi_reduction <maximumf>, %99, %cst_37 [1] : vector<8x8xf32> to vector<8xf32>
    %101 = vector.shape_cast %100 : vector<8xf32> to vector<8x1xf32>
    %102 = vector.broadcast %101 : vector<8x1xf32> to vector<8x8xf32>
    %103 = arith.subf %99, %102 : vector<8x8xf32>
    %104 = math.exp %103 : vector<8x8xf32>
    %cst_38 = arith.constant dense<0.000000e+00> : vector<8xf32>
    %105 = vector.multi_reduction <add>, %104, %cst_38 [1] : vector<8x8xf32> to vector<8xf32>
    %106 = vector.shape_cast %105 : vector<8xf32> to vector<8x1xf32>
    %107 = tpu.reciprocal %106 {approx = true} : vector<8x1xf32> -> vector<8x1xf32>
    %108 = vector.broadcast %107 : vector<8x1xf32> to vector<8x8xf32>
    %109 = arith.mulf %104, %108 : vector<8x8xf32>
    %110 = arith.truncf %109 : vector<8x8xf32> to vector<8x8xbf16>
    %111 = arith.truncf %92 : vector<8x8xf32> to vector<8x8xbf16>
    %cst_39 = arith.constant dense<0.000000e+00> : vector<8x8xf32>
    %112 = tpu.matmul %110, %111, %cst_39 {dimension_numbers = #tpu.dot_dimension_numbers<[1], [0], [0], [1], [0, 0, 1, 1], [], []>} : vector<8x8xbf16>, vector<8x8xbf16>, vector<8x8xf32> -> vector<8x8xf32>
    %113 = vector.extract_strided_slice %19 {offsets = [0, 16], sizes = [8, 8], strides = [1, 1]} : vector<8x32xf32> to vector<8x8xf32>
    %114 = vector.extract_strided_slice %113 {offsets = [0, 0], sizes = [8, 4], strides = [1, 1]} : vector<8x8xf32> to vector<8x4xf32>
    %115 = vector.extract_strided_slice %113 {offsets = [0, 4], sizes = [8, 4], strides = [1, 1]} : vector<8x8xf32> to vector<8x4xf32>
    %116 = arith.mulf %113, %30 : vector<8x8xf32>
    %cst_40 = arith.constant 0.000000e+00 : f32
    %117 = vector.broadcast %cst_40 : f32 to vector<8x4xf32>
    %118 = arith.subf %117, %115 : vector<8x4xf32>
    %119 = tpu.concatenate %118, %114 in 1 : vector<8x4xf32>, vector<8x4xf32> -> vector<8x8xf32>
    %120 = arith.mulf %119, %31 : vector<8x8xf32>
    %121 = arith.addf %116, %120 : vector<8x8xf32>
    %122 = vector.extract_strided_slice %24 {offsets = [0, 16], sizes = [8, 8], strides = [1, 1]} : vector<8x32xf32> to vector<8x8xf32>
    %123 = vector.extract_strided_slice %122 {offsets = [0, 0], sizes = [8, 4], strides = [1, 1]} : vector<8x8xf32> to vector<8x4xf32>
    %124 = vector.extract_strided_slice %122 {offsets = [0, 4], sizes = [8, 4], strides = [1, 1]} : vector<8x8xf32> to vector<8x4xf32>
    %125 = arith.mulf %122, %30 : vector<8x8xf32>
    %cst_41 = arith.constant 0.000000e+00 : f32
    %126 = vector.broadcast %cst_41 : f32 to vector<8x4xf32>
    %127 = arith.subf %126, %124 : vector<8x4xf32>
    %128 = tpu.concatenate %127, %123 in 1 : vector<8x4xf32>, vector<8x4xf32> -> vector<8x8xf32>
    %129 = arith.mulf %128, %31 : vector<8x8xf32>
    %130 = arith.addf %125, %129 : vector<8x8xf32>
    %131 = vector.extract_strided_slice %29 {offsets = [0, 16], sizes = [8, 8], strides = [1, 1]} : vector<8x32xf32> to vector<8x8xf32>
    %132 = arith.truncf %121 : vector<8x8xf32> to vector<8x8xbf16>
    %133 = arith.truncf %130 : vector<8x8xf32> to vector<8x8xbf16>
    %cst_42 = arith.constant dense<0.000000e+00> : vector<8x8xf32>
    %134 = tpu.matmul %132, %133, %cst_42 {dimension_numbers = #tpu.dot_dimension_numbers<[1], [1], [0], [0], [0, 0, 1, 0], [], []>} : vector<8x8xbf16>, vector<8x8xbf16>, vector<8x8xf32> -> vector<8x8xf32>
    %cst_43 = arith.constant 0.353553385 : f32
    %135 = vector.broadcast %cst_43 : f32 to vector<8x8xf32>
    %136 = arith.mulf %134, %135 : vector<8x8xf32>
    %cst_44 = arith.constant 0xFF800000 : f32
    %137 = vector.broadcast %cst_44 : f32 to vector<8x8xf32>
    %138 = arith.select %34, %136, %137 : vector<8x8xi1>, vector<8x8xf32>
    %cst_45 = arith.constant dense<0xFF800000> : vector<8xf32>
    %139 = vector.multi_reduction <maximumf>, %138, %cst_45 [1] : vector<8x8xf32> to vector<8xf32>
    %140 = vector.shape_cast %139 : vector<8xf32> to vector<8x1xf32>
    %141 = vector.broadcast %140 : vector<8x1xf32> to vector<8x8xf32>
    %142 = arith.subf %138, %141 : vector<8x8xf32>
    %143 = math.exp %142 : vector<8x8xf32>
    %cst_46 = arith.constant dense<0.000000e+00> : vector<8xf32>
    %144 = vector.multi_reduction <add>, %143, %cst_46 [1] : vector<8x8xf32> to vector<8xf32>
    %145 = vector.shape_cast %144 : vector<8xf32> to vector<8x1xf32>
    %146 = tpu.reciprocal %145 {approx = true} : vector<8x1xf32> -> vector<8x1xf32>
    %147 = vector.broadcast %146 : vector<8x1xf32> to vector<8x8xf32>
    %148 = arith.mulf %143, %147 : vector<8x8xf32>
    %149 = arith.truncf %148 : vector<8x8xf32> to vector<8x8xbf16>
    %150 = arith.truncf %131 : vector<8x8xf32> to vector<8x8xbf16>
    %cst_47 = arith.constant dense<0.000000e+00> : vector<8x8xf32>
    %151 = tpu.matmul %149, %150, %cst_47 {dimension_numbers = #tpu.dot_dimension_numbers<[1], [0], [0], [1], [0, 0, 1, 1], [], []>} : vector<8x8xbf16>, vector<8x8xbf16>, vector<8x8xf32> -> vector<8x8xf32>
    %152 = vector.extract_strided_slice %19 {offsets = [0, 24], sizes = [8, 8], strides = [1, 1]} : vector<8x32xf32> to vector<8x8xf32>
    %153 = vector.extract_strided_slice %152 {offsets = [0, 0], sizes = [8, 4], strides = [1, 1]} : vector<8x8xf32> to vector<8x4xf32>
    %154 = vector.extract_strided_slice %152 {offsets = [0, 4], sizes = [8, 4], strides = [1, 1]} : vector<8x8xf32> to vector<8x4xf32>
    %155 = arith.mulf %152, %30 : vector<8x8xf32>
    %cst_48 = arith.constant 0.000000e+00 : f32
    %156 = vector.broadcast %cst_48 : f32 to vector<8x4xf32>
    %157 = arith.subf %156, %154 : vector<8x4xf32>
    %158 = tpu.concatenate %157, %153 in 1 : vector<8x4xf32>, vector<8x4xf32> -> vector<8x8xf32>
    %159 = arith.mulf %158, %31 : vector<8x8xf32>
    %160 = arith.addf %155, %159 : vector<8x8xf32>
    %161 = vector.extract_strided_slice %24 {offsets = [0, 24], sizes = [8, 8], strides = [1, 1]} : vector<8x32xf32> to vector<8x8xf32>
    %162 = vector.extract_strided_slice %161 {offsets = [0, 0], sizes = [8, 4], strides = [1, 1]} : vector<8x8xf32> to vector<8x4xf32>
    %163 = vector.extract_strided_slice %161 {offsets = [0, 4], sizes = [8, 4], strides = [1, 1]} : vector<8x8xf32> to vector<8x4xf32>
    %164 = arith.mulf %161, %30 : vector<8x8xf32>
    %cst_49 = arith.constant 0.000000e+00 : f32
    %165 = vector.broadcast %cst_49 : f32 to vector<8x4xf32>
    %166 = arith.subf %165, %163 : vector<8x4xf32>
    %167 = tpu.concatenate %166, %162 in 1 : vector<8x4xf32>, vector<8x4xf32> -> vector<8x8xf32>
    %168 = arith.mulf %167, %31 : vector<8x8xf32>
    %169 = arith.addf %164, %168 : vector<8x8xf32>
    %170 = vector.extract_strided_slice %29 {offsets = [0, 24], sizes = [8, 8], strides = [1, 1]} : vector<8x32xf32> to vector<8x8xf32>
    %171 = arith.truncf %160 : vector<8x8xf32> to vector<8x8xbf16>
    %172 = arith.truncf %169 : vector<8x8xf32> to vector<8x8xbf16>
    %cst_50 = arith.constant dense<0.000000e+00> : vector<8x8xf32>
    %173 = tpu.matmul %171, %172, %cst_50 {dimension_numbers = #tpu.dot_dimension_numbers<[1], [1], [0], [0], [0, 0, 1, 0], [], []>} : vector<8x8xbf16>, vector<8x8xbf16>, vector<8x8xf32> -> vector<8x8xf32>
    %cst_51 = arith.constant 0.353553385 : f32
    %174 = vector.broadcast %cst_51 : f32 to vector<8x8xf32>
    %175 = arith.mulf %173, %174 : vector<8x8xf32>
    %cst_52 = arith.constant 0xFF800000 : f32
    %176 = vector.broadcast %cst_52 : f32 to vector<8x8xf32>
    %177 = arith.select %34, %175, %176 : vector<8x8xi1>, vector<8x8xf32>
    %cst_53 = arith.constant dense<0xFF800000> : vector<8xf32>
    %178 = vector.multi_reduction <maximumf>, %177, %cst_53 [1] : vector<8x8xf32> to vector<8xf32>
    %179 = vector.shape_cast %178 : vector<8xf32> to vector<8x1xf32>
    %180 = vector.broadcast %179 : vector<8x1xf32> to vector<8x8xf32>
    %181 = arith.subf %177, %180 : vector<8x8xf32>
    %182 = math.exp %181 : vector<8x8xf32>
    %cst_54 = arith.constant dense<0.000000e+00> : vector<8xf32>
    %183 = vector.multi_reduction <add>, %182, %cst_54 [1] : vector<8x8xf32> to vector<8xf32>
    %184 = vector.shape_cast %183 : vector<8xf32> to vector<8x1xf32>
    %185 = tpu.reciprocal %184 {approx = true} : vector<8x1xf32> -> vector<8x1xf32>
    %186 = vector.broadcast %185 : vector<8x1xf32> to vector<8x8xf32>
    %187 = arith.mulf %182, %186 : vector<8x8xf32>
    %188 = arith.truncf %187 : vector<8x8xf32> to vector<8x8xbf16>
    %189 = arith.truncf %170 : vector<8x8xf32> to vector<8x8xbf16>
    %cst_55 = arith.constant dense<0.000000e+00> : vector<8x8xf32>
    %190 = tpu.matmul %188, %189, %cst_55 {dimension_numbers = #tpu.dot_dimension_numbers<[1], [0], [0], [1], [0, 0, 1, 1], [], []>} : vector<8x8xbf16>, vector<8x8xbf16>, vector<8x8xf32> -> vector<8x8xf32>
    %191 = tpu.concatenate %73, %112, %151, %190 in 1 : vector<8x8xf32>, vector<8x8xf32>, vector<8x8xf32>, vector<8x8xf32> -> vector<8x32xf32>
    %192 = arith.truncf %191 : vector<8x32xf32> to vector<8x32xbf16>
    %c0_56 = arith.constant 0 : index
    %c0_57 = arith.constant 0 : index
    %193 = vector.load %arg6[%c0_56, %c0_57] : memref<32x32xbf16, #tpu.memory_space<vmem>>, vector<32x32xbf16>
    %cst_58 = arith.constant dense<0.000000e+00> : vector<8x32xf32>
    %194 = tpu.matmul %192, %193, %cst_58 {dimension_numbers = #tpu.dot_dimension_numbers<[1], [0], [0], [1], [0, 0, 1, 1], [], []>} : vector<8x32xbf16>, vector<32x32xbf16>, vector<8x32xf32> -> vector<8x32xf32>
    %c0_59 = arith.constant 0 : index
    %c0_60 = arith.constant 0 : index
    %195 = vector.load %arg10[%c0_59, %c0_60] : memref<1x32xf32, #tpu.memory_space<vmem>>, vector<1x32xf32>
    %196 = vector.broadcast %195 : vector<1x32xf32> to vector<8x32xf32>
    %197 = arith.addf %194, %196 : vector<8x32xf32>
    %198 = arith.addf %0, %197 : vector<8x32xf32>
    %c0_61 = arith.constant 0 : index
    %c0_62 = arith.constant 0 : index
    %199 = vector.load %arg13[%c0_61, %c0_62] : memref<8x32xf32, #tpu.memory_space<vmem>>, vector<8x32xf32>
    tpu.vector_store %arg13[%c0_61, %c0_62], %198 {strides = array<i32>} : memref<8x32xf32, #tpu.memory_space<vmem>>, vector<8x32xf32>,
    return
  }
  func.func @transform_0(%arg0: i32) -> (i32, i32) {
    %c0_i32 = arith.constant 0 : i32
    %c0_i32_0 = arith.constant 0 : i32
    return %arg0, %c0_i32 : i32, i32
  }
  func.func @transform_1(%arg0: i32) -> (i32, i32) {
    %c0_i32 = arith.constant 0 : i32
    %c0_i32_0 = arith.constant 0 : i32
    %c0_i32_1 = arith.constant 0 : i32
    return %c0_i32, %c0_i32_0 : i32, i32
  }
  func.func @transform_2(%arg0: i32) -> (i32, i32) {
    %c0_i32 = arith.constant 0 : i32
    %c0_i32_0 = arith.constant 0 : i32
    %c0_i32_1 = arith.constant 0 : i32
    return %c0_i32, %c0_i32_0 : i32, i32
  }
  func.func @transform_3(%arg0: i32) -> (i32, i32) {
    %c0_i32 = arith.constant 0 : i32
    %c0_i32_0 = arith.constant 0 : i32
    %c0_i32_1 = arith.constant 0 : i32
    return %c0_i32, %c0_i32_0 : i32, i32
  }
  func.func @transform_4(%arg0: i32) -> (i32, i32) {
    %c0_i32 = arith.constant 0 : i32
    %c0_i32_0 = arith.constant 0 : i32
    %c0_i32_1 = arith.constant 0 : i32
    return %c0_i32, %c0_i32_0 : i32, i32
  }
  func.func @transform_5(%arg0: i32) -> (i32, i32) {
    %c0_i32 = arith.constant 0 : i32
    %c0_i32_0 = arith.constant 0 : i32
    %c0_i32_1 = arith.constant 0 : i32
    return %c0_i32, %c0_i32_0 : i32, i32
  }
  func.func @transform_6(%arg0: i32) -> (i32, i32) {
    %c0_i32 = arith.constant 0 : i32
    %c0_i32_0 = arith.constant 0 : i32
    %c0_i32_1 = arith.constant 0 : i32
    return %c0_i32, %c0_i32_0 : i32, i32
  }
  func.func @transform_7(%arg0: i32) -> (i32, i32) {
    %c0_i32 = arith.constant 0 : i32
    %c0_i32_0 = arith.constant 0 : i32
    %c0_i32_1 = arith.constant 0 : i32
    return %c0_i32, %c0_i32_0 : i32, i32
  }
  func.func @transform_8(%arg0: i32) -> (i32, i32) {
    %c0_i32 = arith.constant 0 : i32
    %c0_i32_0 = arith.constant 0 : i32
    %c0_i32_1 = arith.constant 0 : i32
    return %c0_i32, %c0_i32_0 : i32, i32
  }
  func.func @transform_9(%arg0: i32) -> (i32, i32) {
    %c0_i32 = arith.constant 0 : i32
    %c0_i32_0 = arith.constant 0 : i32
    %c0_i32_1 = arith.constant 0 : i32
    return %c0_i32, %c0_i32_0 : i32, i32
  }
  func.func @transform_10(%arg0: i32) -> (i32, i32) {
    %c0_i32 = arith.constant 0 : i32
    %c0_i32_0 = arith.constant 0 : i32
    %c0_i32_1 = arith.constant 0 : i32
    return %c0_i32, %c0_i32_0 : i32, i32
  }
  func.func @transform_11(%arg0: i32) -> (i32, i32) {
    %c0_i32 = arith.constant 0 : i32
    %c0_i32_0 = arith.constant 0 : i32
    %c0_i32_1 = arith.constant 0 : i32
    return %c0_i32, %c0_i32_0 : i32, i32
  }
  func.func @transform_12(%arg0: i32) -> (i32, i32) {
    %c0_i32 = arith.constant 0 : i32
    %c0_i32_0 = arith.constant 0 : i32
    return %arg0, %c0_i32 : i32, i32
  }
}

module attributes {stable_mosaic.version = 11 : i64} {
  func.func @_linear_kernel(%arg0: i32, %arg1: i32, %arg2: i32, %arg3: memref<16x32xbf16, #tpu.memory_space<vmem>>, %arg4: memref<32x64xbf16, #tpu.memory_space<vmem>>, %arg5: memref<1x64xf32, #tpu.memory_space<vmem>>, %arg6: memref<16x64xf32, #tpu.memory_space<vmem>>, %arg7: memref<16x64xf32, #tpu.memory_space<vmem>>) attributes {dimension_semantics = [#tpu.dimension_semantics<parallel>, #tpu.dimension_semantics<parallel>, #tpu.dimension_semantics<arbitrary>], iteration_bounds = array<i64: 1, 1, 1>, scalar_prefetch = 0 : i64, scratch_operands = 1 : i64, tpu.core_type = #tpu.core_type<tc>, window_params = [{transform_indices = @transform_0, window_bounds = array<i64: 16, 32>}, {transform_indices = @transform_1, window_bounds = array<i64: 32, 64>}, {transform_indices = @transform_2, window_bounds = array<i64: 1, 64>}, {transform_indices = @transform_3, window_bounds = array<i64: 16, 64>}]} {
    %c0_i32 = arith.constant 0 : i32
    %0 = arith.cmpi eq, %arg2, %c0_i32 : i32
    %1 = arith.extui %0 : i1 to i32
    %c0_i32_0 = arith.constant 0 : i32
    %2 = arith.cmpi ne, %1, %c0_i32_0 : i32
    scf.if %2 {
      %cst_10 = arith.constant 0.000000e+00 : f32
      %12 = vector.broadcast %cst_10 : f32 to vector<16x64xf32>
      %c0_11 = arith.constant 0 : index
      %c0_12 = arith.constant 0 : index
      %13 = vector.load %arg7[%c0_11, %c0_12] : memref<16x64xf32, #tpu.memory_space<vmem>>, vector<16x64xf32>
      tpu.vector_store %arg7[%c0_11, %c0_12], %12 {strides = array<i32>} : memref<16x64xf32, #tpu.memory_space<vmem>>, vector<16x64xf32>,
    } else {
    }
    %c0 = arith.constant 0 : index
    %c0_1 = arith.constant 0 : index
    %3 = vector.load %arg7[%c0, %c0_1] : memref<16x64xf32, #tpu.memory_space<vmem>>, vector<16x64xf32>
    %c0_2 = arith.constant 0 : index
    %c0_3 = arith.constant 0 : index
    %4 = vector.load %arg3[%c0_2, %c0_3] : memref<16x32xbf16, #tpu.memory_space<vmem>>, vector<16x32xbf16>
    %c0_4 = arith.constant 0 : index
    %c0_5 = arith.constant 0 : index
    %5 = vector.load %arg4[%c0_4, %c0_5] : memref<32x64xbf16, #tpu.memory_space<vmem>>, vector<32x64xbf16>
    %cst = arith.constant dense<0.000000e+00> : vector<16x64xf32>
    %6 = tpu.matmul %4, %5, %cst {dimension_numbers = #tpu.dot_dimension_numbers<[1], [0], [0], [1], [0, 0, 1, 1], [], []>} : vector<16x32xbf16>, vector<32x64xbf16>, vector<16x64xf32> -> vector<16x64xf32>
    %7 = arith.addf %3, %6 : vector<16x64xf32>
    %c0_6 = arith.constant 0 : index
    %c0_7 = arith.constant 0 : index
    %8 = vector.load %arg7[%c0_6, %c0_7] : memref<16x64xf32, #tpu.memory_space<vmem>>, vector<16x64xf32>
    tpu.vector_store %arg7[%c0_6, %c0_7], %7 {strides = array<i32>} : memref<16x64xf32, #tpu.memory_space<vmem>>, vector<16x64xf32>,
    %c0_i32_8 = arith.constant 0 : i32
    %9 = arith.cmpi eq, %arg2, %c0_i32_8 : i32
    %10 = arith.extui %9 : i1 to i32
    %c0_i32_9 = arith.constant 0 : i32
    %11 = arith.cmpi ne, %10, %c0_i32_9 : i32
    scf.if %11 {
      %c0_10 = arith.constant 0 : index
      %c0_11 = arith.constant 0 : index
      %12 = vector.load %arg7[%c0_10, %c0_11] : memref<16x64xf32, #tpu.memory_space<vmem>>, vector<16x64xf32>
      %c0_12 = arith.constant 0 : index
      %c0_13 = arith.constant 0 : index
      %13 = vector.load %arg5[%c0_12, %c0_13] : memref<1x64xf32, #tpu.memory_space<vmem>>, vector<1x64xf32>
      %14 = vector.broadcast %13 : vector<1x64xf32> to vector<16x64xf32>
      %15 = arith.addf %12, %14 : vector<16x64xf32>
      %c0_14 = arith.constant 0 : index
      %c0_15 = arith.constant 0 : index
      %16 = vector.load %arg6[%c0_14, %c0_15] : memref<16x64xf32, #tpu.memory_space<vmem>>, vector<16x64xf32>
      tpu.vector_store %arg6[%c0_14, %c0_15], %15 {strides = array<i32>} : memref<16x64xf32, #tpu.memory_space<vmem>>, vector<16x64xf32>,
    } else {
    }
    return
  }
  func.func @transform_0(%arg0: i32, %arg1: i32, %arg2: i32) -> (i32, i32) {
    %c0_i32 = arith.constant 0 : i32
    return %arg0, %arg2 : i32, i32
  }
  func.func @transform_1(%arg0: i32, %arg1: i32, %arg2: i32) -> (i32, i32) {
    %c0_i32 = arith.constant 0 : i32
    return %arg2, %arg1 : i32, i32
  }
  func.func @transform_2(%arg0: i32, %arg1: i32, %arg2: i32) -> (i32, i32) {
    %c0_i32 = arith.constant 0 : i32
    %c0_i32_0 = arith.constant 0 : i32
    return %c0_i32, %arg1 : i32, i32
  }
  func.func @transform_3(%arg0: i32, %arg1: i32, %arg2: i32) -> (i32, i32) {
    %c0_i32 = arith.constant 0 : i32
    return %arg0, %arg1 : i32, i32
  }
}

module attributes {stable_mosaic.version = 11 : i64} {
  func.func @_moe_block_kernel(%arg0: i32, %arg1: i32, %arg2: memref<4xi32, #tpu.memory_space<smem>>, %arg3: memref<16x1xi32, #tpu.memory_space<vmem>>, %arg4: memref<16x32xf32, #tpu.memory_space<vmem>>, %arg5: memref<1x32xf32, #tpu.memory_space<vmem>>, %arg6: memref<1x32x128xbf16, #tpu.memory_space<vmem>>, %arg7: memref<1x1x128xf32, #tpu.memory_space<vmem>>, %arg8: memref<1x128x32xbf16, #tpu.memory_space<vmem>>, %arg9: memref<1x1x32xf32, #tpu.memory_space<vmem>>, %arg10: memref<16x32xf32, #tpu.memory_space<vmem>>, %arg11: memref<16x32xbf16, #tpu.memory_space<vmem>>) attributes {dimension_semantics = [#tpu.dimension_semantics<parallel>, #tpu.dimension_semantics<arbitrary>], iteration_bounds = array<i64: 1, 4>, scalar_prefetch = 1 : i64, scratch_operands = 1 : i64, tpu.core_type = #tpu.core_type<tc>, window_params = [{transform_indices = @transform_0, window_bounds = array<i64: 16, 1>}, {transform_indices = @transform_1, window_bounds = array<i64: 16, 32>}, {pipeline_mode = #tpu.pipeline_mode<synchronous>, transform_indices = @transform_2, window_bounds = array<i64: 1, 32>}, {transform_indices = @transform_3, window_bounds = array<i64: 1, 32, 128>}, {transform_indices = @transform_4, window_bounds = array<i64: 1, 1, 128>}, {transform_indices = @transform_5, window_bounds = array<i64: 1, 128, 32>}, {transform_indices = @transform_6, window_bounds = array<i64: 1, 1, 32>}, {transform_indices = @transform_7, window_bounds = array<i64: 16, 32>}]} {
    %c0_i32 = arith.constant 0 : i32
    %0 = arith.cmpi eq, %arg1, %c0_i32 : i32
    %1 = arith.extui %0 : i1 to i32
    %c0_i32_0 = arith.constant 0 : i32
    %2 = arith.cmpi ne, %1, %c0_i32_0 : i32
    scf.if %2 {
      %c0 = arith.constant 0 : index
      %c0_3 = arith.constant 0 : index
      %8 = vector.load %arg4[%c0, %c0_3] : memref<16x32xf32, #tpu.memory_space<vmem>>, vector<16x32xf32>
      %9 = arith.mulf %8, %8 : vector<16x32xf32>
      %cst = arith.constant dense<0.000000e+00> : vector<16xf32>
      %10 = vector.multi_reduction <add>, %9, %cst [1] : vector<16x32xf32> to vector<16xf32>
      %11 = vector.shape_cast %10 : vector<16xf32> to vector<16x1xf32>
      %cst_4 = arith.constant 3.200000e+01 : f32
      %12 = vector.broadcast %cst_4 : f32 to vector<16x1xf32>
      %13 = arith.divf %11, %12 : vector<16x1xf32>
      %cst_5 = arith.constant 9.99999997E-7 : f32
      %14 = vector.broadcast %cst_5 : f32 to vector<16x1xf32>
      %15 = arith.addf %13, %14 : vector<16x1xf32>
      %16 = math.rsqrt %15 : vector<16x1xf32>
      %17 = vector.broadcast %16 : vector<16x1xf32> to vector<16x32xf32>
      %18 = arith.mulf %8, %17 : vector<16x32xf32>
      %c0_6 = arith.constant 0 : index
      %c0_7 = arith.constant 0 : index
      %19 = vector.load %arg5[%c0_6, %c0_7] : memref<1x32xf32, #tpu.memory_space<vmem>>, vector<1x32xf32>
      %20 = vector.broadcast %19 : vector<1x32xf32> to vector<16x32xf32>
      %21 = arith.mulf %18, %20 : vector<16x32xf32>
      %22 = arith.truncf %21 : vector<16x32xf32> to vector<16x32xbf16>
      %c0_8 = arith.constant 0 : index
      %c0_9 = arith.constant 0 : index
      %23 = vector.load %arg11[%c0_8, %c0_9] : memref<16x32xbf16, #tpu.memory_space<vmem>>, vector<16x32xbf16>
      tpu.vector_store %arg11[%c0_8, %c0_9], %22 {strides = array<i32>} : memref<16x32xbf16, #tpu.memory_space<vmem>>, vector<16x32xbf16>,
      %c0_10 = arith.constant 0 : index
      %c0_11 = arith.constant 0 : index
      %24 = vector.load %arg10[%c0_10, %c0_11] : memref<16x32xf32, #tpu.memory_space<vmem>>, vector<16x32xf32>
      tpu.vector_store %arg10[%c0_10, %c0_11], %8 {strides = array<i32>} : memref<16x32xf32, #tpu.memory_space<vmem>>, vector<16x32xf32>,
    } else {
    }
    %3 = arith.index_cast %arg1 : i32 to index
    %4 = memref.load %arg2[%3] : memref<4xi32, #tpu.memory_space<smem>>
    %c0_i32_1 = arith.constant 0 : i32
    %5 = arith.cmpi sgt, %4, %c0_i32_1 : i32
    %6 = arith.extui %5 : i1 to i32
    %c0_i32_2 = arith.constant 0 : i32
    %7 = arith.cmpi ne, %6, %c0_i32_2 : i32
    scf.if %7 {
      %c0 = arith.constant 0 : index
      %c0_3 = arith.constant 0 : index
      %8 = vector.load %arg3[%c0, %c0_3] : memref<16x1xi32, #tpu.memory_space<vmem>>, vector<16x1xi32>
      %9 = vector.broadcast %arg1 : i32 to vector<16x1xi32>
      %10 = arith.cmpi eq, %8, %9 : vector<16x1xi32>
      %11 = arith.extui %10 : vector<16x1xi1> to vector<16x1xi32>
      %12 = arith.sitofp %11 : vector<16x1xi32> to vector<16x1xf32>
      %c0_4 = arith.constant 0 : index
      %c0_5 = arith.constant 0 : index
      %13 = vector.load %arg11[%c0_4, %c0_5] : memref<16x32xbf16, #tpu.memory_space<vmem>>, vector<16x32xbf16>
      %c0_6 = arith.constant 0 : index
      %c0_7 = arith.constant 0 : index
      %c0_8 = arith.constant 0 : index
      %14 = vector.load %arg6[%c0_6, %c0_7, %c0_8] : memref<1x32x128xbf16, #tpu.memory_space<vmem>>, vector<1x32x128xbf16>
      %15 = vector.shape_cast %14 : vector<1x32x128xbf16> to vector<32x128xbf16>
      %cst = arith.constant dense<0.000000e+00> : vector<16x128xf32>
      %16 = tpu.matmul %13, %15, %cst {dimension_numbers = #tpu.dot_dimension_numbers<[1], [0], [0], [1], [0, 0, 1, 1], [], []>} : vector<16x32xbf16>, vector<32x128xbf16>, vector<16x128xf32> -> vector<16x128xf32>
      %c0_9 = arith.constant 0 : index
      %c0_10 = arith.constant 0 : index
      %c0_11 = arith.constant 0 : index
      %17 = vector.load %arg7[%c0_9, %c0_10, %c0_11] : memref<1x1x128xf32, #tpu.memory_space<vmem>>, vector<1x1x128xf32>
      %18 = vector.shape_cast %17 : vector<1x1x128xf32> to vector<1x128xf32>
      %19 = vector.broadcast %18 : vector<1x128xf32> to vector<16x128xf32>
      %20 = arith.addf %16, %19 : vector<16x128xf32>
      %cst_12 = arith.constant 0.000000e+00 : f32
      %21 = vector.broadcast %cst_12 : f32 to vector<16x128xf32>
      %22 = arith.maximumf %20, %21 : vector<16x128xf32>
      %23 = vector.broadcast %12 : vector<16x1xf32> to vector<16x128xf32>
      %24 = arith.mulf %22, %23 : vector<16x128xf32>
      %25 = arith.truncf %24 : vector<16x128xf32> to vector<16x128xbf16>
      %c0_13 = arith.constant 0 : index
      %c0_14 = arith.constant 0 : index
      %c0_15 = arith.constant 0 : index
      %26 = vector.load %arg8[%c0_13, %c0_14, %c0_15] : memref<1x128x32xbf16, #tpu.memory_space<vmem>>, vector<1x128x32xbf16>
      %27 = vector.shape_cast %26 : vector<1x128x32xbf16> to vector<128x32xbf16>
      %cst_16 = arith.constant dense<0.000000e+00> : vector<16x32xf32>
      %28 = tpu.matmul %25, %27, %cst_16 {dimension_numbers = #tpu.dot_dimension_numbers<[1], [0], [0], [1], [0, 0, 1, 1], [], []>} : vector<16x128xbf16>, vector<128x32xbf16>, vector<16x32xf32> -> vector<16x32xf32>
      %c0_17 = arith.constant 0 : index
      %c0_18 = arith.constant 0 : index
      %29 = vector.load %arg10[%c0_17, %c0_18] : memref<16x32xf32, #tpu.memory_space<vmem>>, vector<16x32xf32>
      %c0_19 = arith.constant 0 : index
      %c0_20 = arith.constant 0 : index
      %c0_21 = arith.constant 0 : index
      %30 = vector.load %arg9[%c0_19, %c0_20, %c0_21] : memref<1x1x32xf32, #tpu.memory_space<vmem>>, vector<1x1x32xf32>
      %31 = vector.shape_cast %30 : vector<1x1x32xf32> to vector<1x32xf32>
      %32 = vector.broadcast %12 : vector<16x1xf32> to vector<16x32xf32>
      %33 = vector.broadcast %31 : vector<1x32xf32> to vector<16x32xf32>
      %34 = arith.mulf %32, %33 : vector<16x32xf32>
      %35 = arith.addf %28, %34 : vector<16x32xf32>
      %36 = arith.addf %29, %35 : vector<16x32xf32>
      %c0_22 = arith.constant 0 : index
      %c0_23 = arith.constant 0 : index
      %37 = vector.load %arg10[%c0_22, %c0_23] : memref<16x32xf32, #tpu.memory_space<vmem>>, vector<16x32xf32>
      tpu.vector_store %arg10[%c0_22, %c0_23], %36 {strides = array<i32>} : memref<16x32xf32, #tpu.memory_space<vmem>>, vector<16x32xf32>,
    } else {
    }
    return
  }
  func.func @transform_0(%arg0: i32, %arg1: i32, %arg2: memref<4xi32, #tpu.memory_space<smem>>) -> (i32, i32) {
    %c0_i32 = arith.constant 0 : i32
    %c0_i32_0 = arith.constant 0 : i32
    return %arg0, %c0_i32 : i32, i32
  }
  func.func @transform_1(%arg0: i32, %arg1: i32, %arg2: memref<4xi32, #tpu.memory_space<smem>>) -> (i32, i32) {
    %c0_i32 = arith.constant 0 : i32
    %c0_i32_0 = arith.constant 0 : i32
    return %arg0, %c0_i32 : i32, i32
  }
  func.func @transform_2(%arg0: i32, %arg1: i32, %arg2: memref<4xi32, #tpu.memory_space<smem>>) -> (i32, i32) {
    %c0_i32 = arith.constant 0 : i32
    %c0_i32_0 = arith.constant 0 : i32
    %c0_i32_1 = arith.constant 0 : i32
    return %c0_i32, %c0_i32_0 : i32, i32
  }
  func.func @transform_3(%arg0: i32, %arg1: i32, %arg2: memref<4xi32, #tpu.memory_space<smem>>) -> (i32, i32, i32) {
    %c0_i32 = arith.constant 0 : i32
    %c0_i32_0 = arith.constant 0 : i32
    %c0_i32_1 = arith.constant 0 : i32
    return %arg1, %c0_i32, %c0_i32_0 : i32, i32, i32
  }
  func.func @transform_4(%arg0: i32, %arg1: i32, %arg2: memref<4xi32, #tpu.memory_space<smem>>) -> (i32, i32, i32) {
    %c0_i32 = arith.constant 0 : i32
    %c0_i32_0 = arith.constant 0 : i32
    %c0_i32_1 = arith.constant 0 : i32
    return %arg1, %c0_i32, %c0_i32_0 : i32, i32, i32
  }
  func.func @transform_5(%arg0: i32, %arg1: i32, %arg2: memref<4xi32, #tpu.memory_space<smem>>) -> (i32, i32, i32) {
    %c0_i32 = arith.constant 0 : i32
    %c0_i32_0 = arith.constant 0 : i32
    %c0_i32_1 = arith.constant 0 : i32
    return %arg1, %c0_i32, %c0_i32_0 : i32, i32, i32
  }
  func.func @transform_6(%arg0: i32, %arg1: i32, %arg2: memref<4xi32, #tpu.memory_space<smem>>) -> (i32, i32, i32) {
    %c0_i32 = arith.constant 0 : i32
    %c0_i32_0 = arith.constant 0 : i32
    %c0_i32_1 = arith.constant 0 : i32
    return %arg1, %c0_i32, %c0_i32_0 : i32, i32, i32
  }
  func.func @transform_7(%arg0: i32, %arg1: i32, %arg2: memref<4xi32, #tpu.memory_space<smem>>) -> (i32, i32) {
    %c0_i32 = arith.constant 0 : i32
    %c0_i32_0 = arith.constant 0 : i32
    return %arg0, %c0_i32 : i32, i32
  }
}

</mosaic_0001>

<bundles_post_ra>
// kernel: forward.9
= control target key start
LH: loop header
LB: loop body
LE: loop exit
PB: predicated region body
PF: predicated region fallthrough
CT: control target
= control target key end

     0   :  { %v176_v1 = vmov 0.0   ;;  %vm177_vm0 = vmmov 0   ;;  %vm20_vm1 = vcmask 523264   ;;  %s222_s0 = inlined_call_operand.vmem [shape: bf16[16,32], index: 0, kind: input, shape index: {}]   ;;  %s223_s1 = inlined_call_operand.vmem [shape: bf16[32,64], index: 1, kind: input, shape index: {}]   ;;  %s224_s2 = inlined_call_operand.vmem [shape: f32[1,64], index: 2, kind: input, shape index: {}]   ;;  %s225_s3 = inlined_call_operand.hbm [shape: f32[16,64], index: 3, kind: output, shape index: {}]  }
   0x1   :  { %v151_v0 = vld [vmem:[%s223_s1 + $0x8] sm:$0xff]   ;;  %138 = vmatprep.subr.bf16.mxu0 %v176_v1  ;;  %v152_v2 = vld [vmem:[%s223_s1] sm:$0xff]   ;;  %142 = vmatprep.mubr.msk.bf16.mxu0 %vm177_vm0, %v176_v1 }
   0x2   :  { %139 = vmatpush3.bf16.msra.mxu0 %v151_v0 }
   0x3   :  { %140 = vmatprep.subr.bf16.mxu0 %v176_v1 }
   0x4   :  { %8 = vsyncpa [#allocation4], 0  ;;  %21 = vst.msk [vmem:[#allocation2] sm:$0xff] %vm20_vm1, %v176_v1  ;;  %v153_v3 = vld [vmem:[%s222_s0] sm:$0xff]   ;;  %vm48_vm2 = vcmask 261120   ;;  %s178_s0 = smov [#allocation3]  }
   0x5   :  { %22 = vst.msk [vmem:[#allocation2 + $0x8] sm:$0xff] %vm20_vm1, %v176_v1  ;;  %v134_v12 = vld [vmem:[%s224_s2] ss:$0 sm:$0xff]  ;;  %s119_s19 = sshll.u32 %s178_s0, 4  ;;  %s120_s19 = int_to_ptr.vmem [resolvable:$true] %s119_s19 }
   0x6   :  { %141 = vmatpush3.bf16.msra.mxu0 %v152_v2  ;;  %s154_s20 = scalar_lea.vmem %s120_s19, 256  ;;  %p159_p1 = scmp.lt.s32.totalorder %s120_s19, %s120_s19 }
   0x7   :  { %p155_p0 = scmp.ne.s32.totalorder %s120_s19, %s154_s20  ;;  %p160_p2 = scmp.lt.s32.totalorder %s154_s20, %s154_s20 }
   0x9   :  { %143 = vmatmul.mubr.msk.bf16.vlgmr.msra.gmra.mxu0 %vm48_vm2, %v153_v3  ;;  %p161_p3 = por %p160_p2, %p159_p1 }
   0xb   :  { %v23_v4 = vld [vmem:[#allocation2] sm:$0xff]  ;;  %p162_p4 = pnand %p161_p3, %p155_p0 }
   0xc   :  { %v24_v8 = vld [vmem:[#allocation2 + $0x8] sm:$0xff] }
  0xc9   :  { %v86_v5 = vpop.f32.mrf.mxu0 }
  0xca   :  { %v93_v6 = vadd.f32 %v86_v5, %v23_v4 }
  0xcb   :  { %v144_v7 = vpop.f32.mrf.mxu0 }
  0xcc   :  { %96 = vst.msk [vmem:[#allocation2] sm:$0xff] %vm20_vm1, %v93_v6 }
  0xcd   :  { %v89_v9 = vpop.f32.mrf.mxu0 }
  0xce   :  { %v94_v10 = vadd.f32 %v89_v9, %v24_v8 }
  0xcf   :  { %v145_v11 = vpop.f32.mrf.mxu0 }
  0xd0   :  { %97 = vst.msk [vmem:[#allocation2 + $0x8] sm:$0xff] %vm20_vm1, %v94_v10 }
  0xd3   :  { %v101_v13 = vld [vmem:[#allocation2] sm:$0xff] }
  0xd4   :  { %v110_v14 = vadd.f32 %v134_v12, %v101_v13 }
  0xd6   :  { %112 = vst.msk [vmem:[#allocation3] sm:$0xff] %vm20_vm1, %v110_v14 }
  0xd7   :  { %v102_v15 = vld [vmem:[#allocation2 + $0x8] sm:$0xff] }
  0xd8   :  { %v111_v16 = vadd.f32 %v134_v12, %v102_v15 }
  0xda   :  { %113 = vst.msk [vmem:[#allocation3 + $0x8] sm:$0xff] %vm20_vm1, %v111_v16 }
  0xdb   :  { %165 = shalt.err (!%p162_p4)
}
  0xdc   :  { %s179_s21 = smov 128   ;;  %s180_s2 = smov 8  }
  0xdd   :  { %125 = dma.vmem_to_hbm [thread:$0]  %s120_s19, 256, %s225_s3, [#allocation4], %s179_s21, %s179_s21, %s180_s2  }
  0xde   :  { %174 = dma.done.wait [#allocation4], 256  }
  0xdf   :  { %175 = vsyncadd [#allocation4], 4294967040 }
  0xe0   :  { %129 = vsyncpa [#allocation4], 1 }

// kernel: forward.6
= control target key start
LH: loop header
LB: loop body
LE: loop exit
PB: predicated region body
PF: predicated region fallthrough
CT: control target
= control target key end

     0   :  { %s1114_s0 = inlined_call_operand.vmem [shape: s32[4], index: 0, kind: input, shape index: {}]   ;;  %s1115_s1 = inlined_call_operand.vmem [shape: s32[16,1], index: 1, kind: input, shape index: {}]   ;;  %s1116_s2 = inlined_call_operand.vmem [shape: f32[16,32], index: 2, kind: input, shape index: {}]   ;;  %s1117_s3 = inlined_call_operand.vmem [shape: f32[1,32], index: 3, kind: input, shape index: {}]   ;;  %s1118_s4 = inlined_call_operand.vmem [shape: bf16[4,32,128], index: 4, kind: input, shape index: {}]   ;;  %s1119_s5 = inlined_call_operand.vmem [shape: f32[4,1,128], index: 5, kind: input, shape index: {}]   ;;  %s1120_s6 = inlined_call_operand.vmem [shape: bf16[4,128,32], index: 6, kind: input, shape index: {}]   ;;  %s1121_s7 = inlined_call_operand.vmem [shape: f32[4,1,32], index: 7, kind: input, shape index: {}]   ;;  %s1122_s8 = inlined_call_operand.vmem [shape: f32[16,32], index: 8, kind: output, shape index: {}]  }
   0x1   :  { %s13_s29 = sshll.u32 %s1114_s0, 4  ;;  %s14_s29 = int_to_ptr.vmem [resolvable:$true] %s13_s29 }
   0x2   :  { %s912_s30 = scalar_lea.vmem %s14_s29, 16  ;;  %p917_p1 = scmp.lt.s32.totalorder %s14_s29, %s14_s29 }
   0x3   :  { %p913_p0 = scmp.ne.s32.totalorder %s14_s29, %s912_s30  ;;  %p918_p2 = scmp.lt.s32.totalorder %s912_s30, %s912_s30 }
   0x5   :  { %p919_p3 = por %p918_p2, %p917_p1 }
   0x7   :  { %p920_p4 = pnand %p919_p3, %p913_p0 }
   0x9   :  { %923 = shalt.err (!%p920_p4)  }
   0xa   :  { %s950_s9 = smov [#allocation4]  }
   0xb   :  { %16 = dma.vmem_to_smem %s14_s29, 16, %s950_s9, [#allocation3] }
   0xc   :  { %936 = dma.done.wait [#allocation3], 16 }
   0xd   :  { %937 = vsyncadd [#allocation3], 4294967280 }
   0xe   :  { %18 = sfence }
   0xf   :  { %s1002_s10 = smov 0   ;;  %s1004_s11 = smov 0  }
  0x10   :  { %s1006_s12 = smov 0  }
  0x11 LB: > { %s33_s0 = sadd.s32 1, %s944_s11  ;;  %p789_p5 = scmp.ge.s32.totalorder %s948_s12, 1  ;;  %s948_s12 = sphi %s1006_s12, %s24_s12   ;;  %s944_s11 = sphi %s1004_s11, %s1124_s11   ;;  %s940_s10 = sphi %s1002_s10, %s1123_s10  }
  0x12   : > { %p34_p6 = scmp.ge.s32.totalorder %s33_s0, 4  ;;  %p304_p7 = scmp.lt.s32.totalorder %s948_s12, 5 }
  0x14   : > { %s1126_s0 = smov (%p34_p6, %s33_s0), 0  ;;  %p305_p8 = pnand %p789_p5, %p304_p7 }
  0x15   : > { %p369_p9 = scmp.lt.s32.totalorder (!%p305_p8), %s940_s10, 3  ;;  %p794_p10 = scmp.ne.s32.totalorder (!%p305_p8), %s940_s10, 0 }
  0x16   : > { %308 = sbr.rel (%p305_p8) target bundleno = 633 (0x279), region = 48 }
  0x1b   : > { %s1024_s13 = scalar_select %p369_p9, %s940_s10, 3 }
  0x1c   : > { %395 = sbr.rel (%p794_p10) target bundleno = 204 (0xcc), region = 52 }
  0x1d   : > { %s819_s14 = sshll.u32 %s1024_s13, 4  ;;  %s376_s17 = scalar_lea.vmem %s1119_s5, %s1024_s13 }
  0x1e   : > { %s1034_s20 = scalar_lea.vmem %s1118_s4, %s819_s14  ;;  %s820_s21 = sshll.u32 %s1024_s13, 6 }
  0x1f   : > { %s1040_s24 = scalar_lea.vmem %s1120_s6, %s820_s21  ;;  %s384_s27 = scalar_lea.vmem %s1121_s7, %s1024_s13 }
  0x21   : > { %v396_v0 = vld [vmem:[%s1116_s2] sm:$0xff]  ;;  %vm400_vm0 = vcmask 261120   ;;  %v397_v1 = vld [vmem:[%s1116_s2 + $0x8] sm:$0xff]  ;;  %vm433_vm1 = vcmask 257024  }
  0x22   : > { %v398_v2 = vmul.f32 %v396_v0, %v396_v0  ;;  %436 = vst.msk [vmem:[%s1122_s8] sm:$0xff] %vm400_vm0, %v396_v0  ;;  %v399_v3 = vmul.f32 %v397_v1, %v397_v1  ;;  %437 = vst.msk [vmem:[%s1122_s8 + $0x8] sm:$0xff] %vm400_vm0, %v397_v1  ;;  %v795_v13 = vld [vmem:[%s1117_s3] ss:$0 sm:$0xff] }
  0x24   : > { %v401_v4 = vsel %vm400_vm0, %v398_v2, 0.0  ;;  %v404_v5 = vsel %vm400_vm0, %v399_v3, 0.0 }
  0x25   : > { %402 = vadd.xlane.f32.xlu0 %v401_v4 }
  0x29   : > { %405 = vadd.xlane.f32.xlu0 %v404_v5 }
  0xae   : > { %v403_v6 = vpop.xlane.xlu0 %402 }
  0xaf   : > { %v408_v7 = vmul.f32 0.03125, %v403_v6 }
  0xb1   : > { %v410_v8 = vadd.f32 1e-06, %v408_v7 }
  0xb2   : > { %v406_v9 = vpop.xlane.xlu0 %405 }
  0xb3   : > { %891 = vrsqrt.f32 %v410_v8  ;;  %v409_v10 = vmul.f32 0.03125, %v406_v9 }
  0xb5   : > { %v411_v11 = vadd.f32 1e-06, %v409_v10 }
  0xb7   : > { %893 = vrsqrt.f32 %v411_v11 }
  0xc0   : > { %v892_v12 = vpop.eup %891 }
  0xc1   : > { %v414_v14 = vmul.f32 %v892_v12, %v396_v0 }
  0xc3   : > { %v423_v15 = vmul.f32 %v795_v13, %v414_v14 }
  0xc4   : > { %v894_v16 = vpop.eup %893 }
  0xc5   : > { %v821_v17 = vpack.c.bf16 %v423_v15, %v423_v15  ;;  %v415_v18 = vmul.f32 %v894_v16, %v397_v1 }
  0xc7   : > { %434 = vst.msk [vmem:[#allocation2] sm:$0xf] %vm433_vm1, %v821_v17  ;;  %v424_v19 = vmul.f32 %v795_v13, %v415_v18 }
  0xc9   : > { %v822_v20 = vpack.c.bf16 %v424_v19, %v424_v19 }
  0xcb   : > { %435 = vst.msk [vmem:[#allocation2 + $0x4] sm:$0xf] %vm433_vm1, %v822_v20 }
  0xcc PF: > { %s438_s22 = sld [smem:[#allocation4 + %s940_s10]] }
  0xd2   : > { %p798_p11 = scmp.le.s32.totalorder %s438_s22, 0 }
  0xd4   : > { %442 = sbr.rel (%p798_p11) target bundleno = 633 (0x279), region = 56 }
  0xd9   : > { %v901_v21 = vld [vmem:[%s1034_s20 + $0x8] sm:$0xff]   ;;  %v951_v22 = vmov 0.0   ;;  %v445_v23 = vstv %s940_s10  ;;  %v902_v24 = vld [vmem:[%s1034_s20] sm:$0xff]   ;;  %vm952_vm2 = vmmov 0   ;;  %v953_v28 = vmov 0   ;;  %v904_v29 = vld [vmem:[%s1040_s24 + $0x38] sm:$0xff]  }
  0xda   : > { %835 = vmatprep.subr.bf16.mxu0 %v951_v22  ;;  %843 = vmatprep.subr.bf16.mxu1 %v951_v22  ;;  %v903_v25 = vld [vmem:[#allocation2] sm:$0xff]   ;;  %v444_v27 = vld [vmem:[%s1115_s1 + $0x8] sm:$0xff]  ;;  %vm482_vm5 = vcmask 261120   ;;  %v905_v32 = vld [vmem:[%s1040_s24 + $0x30] sm:$0xff]  }
  0xdb   : > { %836 = vmatpush3.bf16.msra.mxu0 %v901_v21  ;;  %839 = vmatprep.mubr.msk.bf16.mxu0 %vm952_vm2, %v951_v22  ;;  %v443_v26 = vld [vmem:[%s1115_s1] sm:$0xff]  ;;  %vm447_vm4 = vcmp.eq.s32.totalorder %v444_v27, %v445_v23  ;;  %v906_v34 = vld [vmem:[%s1040_s24 + $0x28] sm:$0xff]   ;;  %v908_v36 = vld [vmem:[%s1040_s24 + $0x18] sm:$0xff]  }
  0xdc   : > { %837 = vmatprep.subr.bf16.mxu0 %v951_v22  ;;  %859 = vmatprep.mubr.msk.bf16.mxu1 %vm952_vm2, %v951_v22  ;;  %vm446_vm3 = vcmp.eq.s32.totalorder %v443_v26, %v445_v23  ;;  %v800_v31 = vsel %vm447_vm4, 1.0, %v951_v22  ;;  %v907_v35 = vld [vmem:[%s1040_s24 + $0x20] sm:$0xff]   ;;  %v909_v37 = vld [vmem:[%s1040_s24 + $0x10] sm:$0xff]   ;;  %v910_v38 = vld [vmem:[%s1040_s24 + $0x8] sm:$0xff]  }
  0xdd   : > { %895 = vset.pattern.permute.xlu0 %v953_v28  ;;  %v799_v30 = vsel %vm446_vm3, 1.0, %v951_v22  ;;  %844 = vmatpush3.bf16.msra.mxu1 %v904_v29  ;;  %v911_v39 = vld [vmem:[%s1040_s24] sm:$0xff]   ;;  %v559_v63 = vld [vmem:[%s1122_s8 + $0x8] sm:$0xff] }
  0xde   : > { %v896_v33 = vpack.i.bf16 %v800_v31, %v799_v30  ;;  %845 = vmatprep.subr.bf16.mxu1 %v951_v22  ;;  %v801_v40 = vld [vmem:[%s376_s17] ss:$0 sm:$0xff] }
  0xdf   : > { %838 = vmatpush3.bf16.msra.mxu0 %v902_v24  ;;  %v806_v55 = vld [vmem:[%s384_s27] ss:$0 sm:$0xff] }
  0xe0   : > { %897 = vperm.xlu0 %895, %v896_v33   ;;  %v558_v57 = vld [vmem:[%s1122_s8] sm:$0xff] }
  0xe1   : > { %846 = vmatpush3.bf16.msra.mxu1 %v905_v32 }
  0xe2   : > { %840 = vmatmul.mubr.msk.bf16.vlgmr.msra.gmra.mxu0 %vm482_vm5, %v903_v25  ;;  %847 = vmatprep.subr.bf16.mxu1 %v951_v22 }
  0xe5   : > { %848 = vmatpush3.bf16.msra.mxu1 %v906_v34 }
  0xe6   : > { %849 = vmatprep.subr.bf16.mxu1 %v951_v22 }
  0xe9   : > { %850 = vmatpush3.bf16.msra.mxu1 %v907_v35 }
  0xea   : > { %851 = vmatprep.subr.bf16.mxu1 %v951_v22 }
  0xed   : > { %852 = vmatpush3.bf16.msra.mxu1 %v908_v36 }
  0xee   : > { %853 = vmatprep.subr.bf16.mxu1 %v951_v22 }
  0xf1   : > { %854 = vmatpush3.bf16.msra.mxu1 %v909_v37 }
  0xf2   : > { %855 = vmatprep.subr.bf16.mxu1 %v951_v22 }
  0xf5   : > { %856 = vmatpush3.bf16.msra.mxu1 %v910_v38 }
  0xf6   : > { %857 = vmatprep.subr.bf16.mxu1 %v951_v22 }
  0xf9   : > { %858 = vmatpush3.bf16.msra.mxu1 %v911_v39 }
 0x15b   : > { %v898_v44 = vpop.permute.xlu0 %897 }
 0x15c   : > { %v900_v47 = vunpack.i.h.bf16 %v898_v44  ;;  %v899_v48 = vunpack.i.l.bf16 %v898_v44 }
 0x15e   : > { %v567_v56 = vmul.f32 %v899_v48, %v806_v55  ;;  %v568_v62 = vmul.f32 %v900_v47, %v806_v55 }
 0x1a2   : > { %v520_v41 = vpop.f32.mrf.mxu0 }
 0x1a3   : > { %v521_v42 = vadd.f32 %v801_v40, %v520_v41 }
 0x1a4   : > { %v841_v43 = vpop.f32.mrf.mxu0 }
 0x1a5   : > { %v527_v46 = vmax.f32 %v521_v42, 0.0 }
 0x1a6   : > { %v523_v45 = vpop.f32.mrf.mxu0 }
 0x1a7   : > { %v524_v49 = vadd.f32 %v801_v40, %v523_v45  ;;  %v539_v52 = vmul.f32 %v899_v48, %v527_v46 }
 0x1a8   : > { %v842_v50 = vpop.f32.mrf.mxu0 }
 0x1a9   : > { %v528_v51 = vmax.f32 %v524_v49, 0.0 }
 0x1ab   : > { %v540_v53 = vmul.f32 %v900_v47, %v528_v51 }
 0x1ad   : > { %v541_v54 = vpack.c.bf16 %v540_v53, %v539_v52 }
 0x1af   : > { %860 = vmatmul.mubr.bf16.vlgmr.msra.gmra.mxu1 %v541_v54 }
 0x26f   : > { %v651_v58 = vpop.f32.mrf.mxu1 }
 0x270   : > { %v652_v59 = vadd.f32 %v651_v58, %v567_v56 }
 0x271   : > { %v861_v60 = vpop.f32.mrf.mxu1 }
 0x272   : > { %v658_v61 = vadd.f32 %v652_v59, %v558_v57 }
 0x273   : > { %v654_v0 = vpop.f32.mrf.mxu1 }
 0x274   : > { %660 = vst.msk [vmem:[%s1122_s8] sm:$0xff] %vm482_vm5, %v658_v61  ;;  %v655_v1 = vadd.f32 %v654_v0, %v568_v62 }
 0x275   : > { %v862_v2 = vpop.f32.mrf.mxu1 }
 0x276   : > { %v659_v3 = vadd.f32 %v655_v1, %v559_v63 }
 0x278   : > { %661 = vst.msk [vmem:[%s1122_s8 + $0x8] sm:$0xff] %vm482_vm5, %v659_v3 }
 0x279 PF: > { %s24_s12 = sadd.s32 1, %s948_s12   ;;  %s1123_s10 = smov %s944_s11 }
 0x27a   : > { %p21_p12 = scmp.ge.s32.totalorder %s24_s12, 6   ;;  %s1124_s11 = smov %s1126_s0 }
 0x27c   :  { %23 = sbr.rel (!%p21_p12) target bundleno = 17 (0x11), region = 101 }

// kernel: forward.5
= control target key start
LH: loop header
LB: loop body
LE: loop exit
PB: predicated region body
PF: predicated region fallthrough
CT: control target
= control target key end

     0   :  { %s1624_s21 = smov 0   ;;  %s1858_s0 = inlined_call_operand.vmem [shape: f32[16,32], index: 0, kind: input, shape index: {}]   ;;  %s1859_s1 = inlined_call_operand.vmem [shape: f32[1,32], index: 1, kind: input, shape index: {}]   ;;  %s1860_s2 = inlined_call_operand.vmem [shape: bf16[32,32], index: 2, kind: input, shape index: {}]   ;;  %s1861_s3 = inlined_call_operand.vmem [shape: bf16[32,32], index: 3, kind: input, shape index: {}]   ;;  %s1862_s4 = inlined_call_operand.vmem [shape: bf16[32,32], index: 4, kind: input, shape index: {}]   ;;  %s1863_s5 = inlined_call_operand.vmem [shape: bf16[32,32], index: 5, kind: input, shape index: {}]   ;;  %s1864_s6 = inlined_call_operand.vmem [shape: f32[1,32], index: 6, kind: input, shape index: {}]   ;;  %s1865_s7 = inlined_call_operand.vmem [shape: f32[1,32], index: 7, kind: input, shape index: {}]   ;;  %s1866_s8 = inlined_call_operand.vmem [shape: f32[1,32], index: 8, kind: input, shape index: {}]   ;;  %s1867_s9 = inlined_call_operand.vmem [shape: f32[1,32], index: 9, kind: input, shape index: {}]   ;;  %s1868_s10 = inlined_call_operand.vmem [shape: f32[8,8], index: 10, kind: input, shape index: {}]   ;;  %s1869_s11 = inlined_call_operand.vmem [shape: f32[8,8], index: 11, kind: input, shape index: {}]   ;;  %s1870_s12 = inlined_call_operand.vmem [shape: f32[16,32], index: 12, kind: output, shape index: {}]  }
   0x1 LB: > { %s1349_s22 = sadd.s32 4294967295, %s1544_s21   ;;  %p1353_p0 = scmp.ge.s32.totalorder %s1544_s21, 1  ;;  %s1544_s21 = sphi %s1624_s21, %s22_s21  }
   0x2   : > { %p361_p1 = scmp.lt.s32.totalorder %s1544_s21, 3 }
   0x4   : > { %p362_p2 = pnand %p1353_p0, %p361_p1 }
   0x5   : > { %p401_p3 = scmp.lt.s32.totalorder (!%p362_p2), %s1349_s22, 1  ;;  %s1548_s30 = smov (!%p362_p2), 124  }
   0x6   : > { %365 = sbr.rel (%p362_p2) target bundleno = 1816 (0x718), region = 68  ;;  %s1549_s13 = smov (!%p362_p2), 116  }
   0x7   : > { %s1550_s16 = smov (!%p362_p2), 100   ;;  %s1551_s19 = smov (!%p362_p2), 8  }
   0x8   : > { %s1552_s20 = smov (!%p362_p2), 16   ;;  %s1553_s24 = smov (!%p362_p2), 108  }
   0x9   : > { %s1554_s27 = smov (!%p362_p2), 24   ;;  %s1555_s28 = smov (!%p362_p2), 4  }
   0xa   : > { %s1556_s29 = smov (!%p362_p2), 120  }
   0xb   : > { %s1872_s22 = smov (!%p401_p3, %s1349_s22), 1  ;;  %vm412_vm0 = vcmask 261120   ;;  %v1512_v3 = vld [vmem:[%s1860_s2 + $0x8] sm:$0xff]   ;;  %v1546_v5 = vmov 0.0   ;;  %v1514_v6 = vld [vmem:[%s1860_s2] sm:$0xff]   ;;  %vm1547_vm1 = vmmov 0  }
   0xc   : > { %s1354_s23 = sshll.u32 %s1872_s22, 3  ;;  %v1513_v4 = vld [vmem:[%s1861_s3 + $0x8] sm:$0xff]   ;;  %1411 = vmatprep.subr.bf16.mxu0 %v1546_v5  ;;  %1419 = vmatprep.subr.bf16.mxu1 %v1546_v5  ;;  %v1515_v7 = vld [vmem:[%s1861_s3] sm:$0xff]   ;;  %vm723_vm2 = vcmask 1043456   ;;  %vm639_vm3 = vcmask 31744   ;;  %vm658_vm4 = vcmask 64512  }
   0xd   : > { %s404_s26 = scalar_lea.vmem %s1858_s0, %s1354_s23  ;;  %1412 = vmatpush3.bf16.msra.mxu0 %v1512_v3  ;;  %1420 = vmatpush3.bf16.msra.mxu1 %v1513_v4  ;;  %v1356_v12 = vld [vmem:[%s1859_s1] ss:$0 sm:$0xff]  ;;  %v1516_v15 = vld [vmem:[%s1862_s4 + $0x8] sm:$0xff]   ;;  %vm1223_vm6 = vcmask 130048   ;;  %vm1225_vm7 = vcmask 195584   ;;  %s408_s25 = scalar_lea.vmem %s1870_s12, %s1354_s23 }
   0xe   : > { %v1640_v0 = vld [vmem:[%s404_s26] sm:$0xff]  ;;  %1413 = vmatprep.subr.bf16.mxu0 %v1546_v5  ;;  %1421 = vmatprep.subr.bf16.mxu1 %v1546_v5 }
   0xf   : > { %v411_v1 = vmul.f32 %v1640_v0, %v1640_v0  ;;  %1415 = vmatprep.mubr.msk.bf16.mxu0 %vm1547_vm1, %v1546_v5  ;;  %1423 = vmatprep.mubr.msk.bf16.mxu1 %vm1547_vm1, %v1546_v5  ;;  %v1517_v17 = vld [vmem:[%s1862_s4] sm:$0xff]  }
  0x10   : > { %v1361_v18 = vld [vmem:[%s1865_s7] ss:$0 sm:$0xff] }
  0x11   : > { %v413_v2 = vsel %vm412_vm0, %v411_v1, 0.0  ;;  %1414 = vmatpush3.bf16.msra.mxu0 %v1514_v6  ;;  %1422 = vmatpush3.bf16.msra.mxu1 %v1515_v7  ;;  %v1357_v22 = vld [vmem:[%s1864_s6] ss:$0 sm:$0xff] }
  0x12   : > { %414 = vadd.xlane.f32.xlu0 %v413_v2  ;;  %1427 = vmatprep.subr.bf16.mxu0 %v1546_v5  ;;  %v1365_v31 = vld [vmem:[%s1866_s8] ss:$0 sm:$0xff] }
  0x13   : > { %1435 = vmatprep.subr.bf16.mxu1 %v1546_v5  ;;  %v1721_v40 = vld [vmem:[%s1868_s10] sm:$0xff] }
  0x14   : > { %v1733_v42 = vld [vmem:[%s1869_s11] sm:$0xff] }
  0x9b   : > { %v415_v8 = vpop.xlane.xlu0 %414 }
  0x9c   : > { %v417_v9 = vmul.f32 0.03125, %v415_v8 }
  0x9e   : > { %v418_v10 = vadd.f32 1e-06, %v417_v9 }
  0xa0   : > { %1520 = vrsqrt.f32 %v418_v10 }
  0xad   : > { %v1521_v11 = vpop.eup %1520 }
  0xae   : > { %v420_v13 = vmul.f32 %v1521_v11, %v1640_v0 }
  0xb0   : > { %v428_v14 = vmul.f32 %v1356_v12, %v420_v13 }
  0xb2   : > { %v429_v16 = vpack.c.bf16 %v428_v14, %v428_v14 }
  0xb4   : > { %1416 = vmatmul.mubr.msk.bf16.vlgmr.msra.gmra.mxu0 %vm412_vm0, %v429_v16  ;;  %1424 = vmatmul.mubr.msk.bf16.vlgmr.msra.gmra.mxu1 %vm412_vm0, %v429_v16 }
  0xb5   : > { %1428 = vmatpush3.bf16.msra.mxu0 %v1516_v15  ;;  %1431 = vmatprep.mubr.msk.bf16.mxu0 %vm1547_vm1, %v1546_v5 }
  0xb6   : > { %1429 = vmatprep.subr.bf16.mxu0 %v1546_v5  ;;  %1437 = vmatprep.mubr.msk.bf16.mxu1 %vm1547_vm1, %v1546_v5 }
  0xb9   : > { %1430 = vmatpush3.bf16.msra.mxu0 %v1517_v17 }
  0xba   : > { %1441 = vmatprep.subr.bf16.mxu0 %v1546_v5 }
  0xbc   : > { %1432 = vmatmul.mubr.msk.bf16.vlgmr.msra.gmra.mxu0 %vm412_vm0, %v429_v16 }
  0xbd   : > { %1443 = vmatprep.mubr.msk.bf16.mxu0 %vm1547_vm1, %v1546_v5 }
 0x174   : > { %v490_v19 = vpop.f32.mrf.mxu0  ;;  %v553_v20 = vpop.f32.mrf.mxu1 }
 0x175   : > { %v1691_v21 = vadd.f32 %v1361_v18, %v553_v20  ;;  %v1701_v28 = vadd.f32 %v1357_v22, %v490_v19 }
 0x176   : > { %v1417_v23 = vpop.f32.mrf.mxu0  ;;  %v1425_v24 = vpop.f32.mrf.mxu1 }
 0x177   : > { %789 = vrot.lane.b32.xlu1 %v1691_v21, %s1548_s30  ;;  %v1699_v25 = vsub.f32 0.0, %v1691_v21  ;;  %v630_v36 = vsub.f32 0.0, %v1701_v28 }
 0x178   : > { %v493_v26 = vpop.f32.mrf.mxu0  ;;  %v556_v27 = vpop.f32.mrf.mxu1 }
 0x179   : > { %786 = vrot.lane.b32.xlu0 %v1699_v25, %s1549_s13 }
 0x17a   : > { %v1418_v29 = vpop.f32.mrf.mxu0  ;;  %v1426_v30 = vpop.f32.mrf.mxu1 }
 0x17b   : > { %775 = vrot.lane.b32.xlu1 %v1701_v28, %s1548_s30 }
 0x17c   : > { %v616_v32 = vpop.f32.mrf.mxu0 }
 0x17d   : > { %v617_v33 = vadd.f32 %v1365_v31, %v616_v32  ;;  %1081 = vrot.lane.b32.xlu0 %v1699_v25, %s1550_s16 }
 0x17e   : > { %v1433_v34 = vpop.f32.mrf.mxu0 }
 0x17f   : > { %v1710_v35 = vpack.c.bf16 %v617_v33, %v617_v33  ;;  %937 = vrot.lane.b32.xlu1 %v1691_v21, %s1549_s13 }
 0x180   : > { %v619_v37 = vpop.f32.mrf.mxu0 }
 0x181   : > { %1067 = vrot.lane.b32.xlu0 %v630_v36, %s1550_s16  ;;  %v725_v38 = vsel %vm723_vm2, %v1710_v35, 0  ;;  %v643_v37 = vmul.f32 %v1721_v40, %v1691_v21 }
 0x182   : > { %v1434_v39 = vpop.f32.mrf.mxu0  ;;  %1442 = vmatpush3.bf16.msra.mxu0 %v725_v38 }
 0x183   : > { %923 = vrot.lane.b32.xlu1 %v1701_v28, %s1549_s13  ;;  %1453 = vmatprep.subr.bf16.mxu0 %v1546_v5 }
 0x185   : > { %768 = vrot.lane.b32.xlu0 %v1721_v40, %s1551_s19 }
 0x187   : > { %772 = vrot.lane.b32.xlu1 %v630_v36, %s1549_s13  ;;  %s1558_s13 = smov 104  }
 0x189   : > { %916 = vrot.lane.b32.xlu0 %v1721_v40, %s1552_s20 }
 0x18b   : > { %934 = vrot.lane.b32.xlu1 %v1699_v25, %s1553_s24 }
 0x18f   : > { %920 = vrot.lane.b32.xlu1 %v630_v36, %s1553_s24 }
 0x193   : > { %1084 = vrot.lane.b32.xlu1 %v1691_v21, %s1553_s24 }
 0x197   : > { %1070 = vrot.lane.b32.xlu1 %v1701_v28, %s1553_s24 }
 0x1e9   : > { %v790_v41 = vpop.permute.xlu1 %789 }
 0x1eb   : > { %v787_v43 = vpop.permute.xlu0 %786 }
 0x1ec   : > { %v792_v44 = vsel %vm639_vm3, %v787_v43, %v790_v41 }
 0x1ed   : > { %v793_v45 = vmul.f32 %v792_v44, %v1733_v42  ;;  %v776_v46 = vpop.permute.xlu1 %775 }
 0x1ef   : > { %795 = vrot.lane.b32.xlu1 %v793_v45, %s1551_s19  ;;  %v1082_v57 = vpop.permute.xlu0 %1081 }
 0x1f1   : > { %v938_v47 = vpop.permute.xlu1 %937 }
 0x1f3   : > { %v1068_v62 = vpop.permute.xlu0 %1067 }
 0x1f5   : > { %v924_v48 = vpop.permute.xlu1 %923 }
 0x1f7   : > { %v769_v3 = vpop.permute.xlu0 %768 }
 0x1f8   : > { %v785_v4 = vmul.f32 %v769_v3, %v1691_v21  ;;  %v771_v9 = vmul.f32 %v769_v3, %v1701_v28 }
 0x1f9   : > { %v773_v49 = vpop.permute.xlu1 %772 }
 0x1fa   : > { %v778_v50 = vsel %vm639_vm3, %v773_v49, %v776_v46 }
 0x1fb   : > { %v779_v51 = vmul.f32 %v778_v50, %v1733_v42  ;;  %v917_v10 = vpop.permute.xlu0 %916 }
 0x1fc   : > { %v933_v13 = vmul.f32 %v917_v10, %v1691_v21  ;;  %v919_v17 = vmul.f32 %v917_v10, %v1701_v28 }
 0x1fd   : > { %781 = vrot.lane.b32.xlu1 %v779_v51, %s1551_s19  ;;  %v935_v52 = vpop.permute.xlu1 %934 }
 0x1fe   : > { %v940_v53 = vsel %vm639_vm3, %v935_v52, %v938_v47  ;;  %v629_v47 = vmul.f32 %v1721_v40, %v1701_v28 }
 0x1ff   : > { %v941_v54 = vmul.f32 %v940_v53, %v1733_v42 }
 0x201   : > { %1063 = vrot.lane.b32.xlu1 %v1721_v40, %s1554_s27  ;;  %943 = vrot.lane.b32.xlu0 %v941_v54, %s1552_s20  ;;  %v921_v55 = vpop.permute.xlu1 %920 }
 0x202   : > { %v926_v56 = vsel %vm639_vm3, %v921_v55, %v924_v48 }
 0x203   : > { %v927_v58 = vmul.f32 %v926_v56, %v1733_v42  ;;  %v624_v56 = vlaneseq }
 0x205   : > { %929 = vrot.lane.b32.xlu0 %v927_v58, %s1552_s20  ;;  %v1085_v59 = vpop.permute.xlu1 %1084  ;;  %v627_v58 = vand.u32 127, %v624_v56 }
 0x206   : > { %v1087_v60 = vsel %vm639_vm3, %v1082_v57, %v1085_v59  ;;  %v625_v57 = vshrl.u32 %v624_v56, 7 }
 0x207   : > { %v1088_v61 = vmul.f32 %v1087_v60, %v1733_v42 }
 0x208   : > { %vm628_vm5 = vcmp.le.s32.totalorder %v627_v58, %v625_v57 }
 0x209   : > { %1090 = vrot.lane.b32.xlu1 %v1088_v61, %s1554_s27  ;;  %v1071_v63 = vpop.permute.xlu1 %1070 }
 0x20a   : > { %v1073_v1 = vsel %vm639_vm3, %v1068_v62, %v1071_v63 }
 0x20b   : > { %v1074_v2 = vmul.f32 %v1073_v1, %v1733_v42 }
 0x20d   : > { %646 = vrot.lane.b32.xlu1 %v1699_v25, %s1548_s30  ;;  %1076 = vrot.lane.b32.xlu0 %v1074_v2, %s1554_s27 }
 0x211   : > { %632 = vrot.lane.b32.xlu1 %v630_v36, %s1548_s30  ;;  %650 = vrot.lane.b32.xlu0 %v1691_v21, %s1555_s28  ;;  %s1557_s30 = smov 112  }
 0x215   : > { %636 = vrot.lane.b32.xlu0 %v1701_v28, %s1555_s28 }
 0x261   : > { %v796_v6 = vpop.permute.xlu1 %795 }
 0x262   : > { %v798_v7 = vadd.f32 %v796_v6, %v785_v4 }
 0x264   : > { %v800_v8 = vpack.c.bf16 %v798_v7, %v798_v7 }
 0x266   : > { %805 = vrot.lane.b32.xlu1 %v800_v8, %s1556_s29 }
 0x26f   : > { %v782_v11 = vpop.permute.xlu1 %781 }
 0x270   : > { %v784_v12 = vadd.f32 %v782_v11, %v771_v9 }
 0x272   : > { %v799_v14 = vpack.c.bf16 %v784_v12, %v784_v12 }
 0x273   : > { %v944_v15 = vpop.permute.xlu0 %943  ;;  %v1064_v19 = vpop.permute.xlu1 %1063 }
 0x274   : > { %v946_v16 = vadd.f32 %v944_v15, %v933_v13  ;;  %802 = vrot.lane.b32.xlu0 %v799_v14, %s1556_s29  ;;  %v1080_v23 = vmul.f32 %v1064_v19, %v1691_v21  ;;  %v1066_v27 = vmul.f32 %v1064_v19, %v1701_v28 }
 0x276   : > { %v948_v18 = vpack.c.bf16 %v946_v16, %v946_v16 }
 0x277   : > { %v930_v20 = vpop.permute.xlu0 %929 }
 0x278   : > { %v932_v22 = vadd.f32 %v930_v20, %v919_v17  ;;  %953 = vrot.lane.b32.xlu1 %v948_v18, %s1557_s30 }
 0x27a   : > { %v947_v24 = vpack.c.bf16 %v932_v22, %v932_v22 }
 0x27b   : > { %v1091_v25 = vpop.permute.xlu1 %1090 }
 0x27c   : > { %v1093_v26 = vadd.f32 %v1091_v25, %v1080_v23  ;;  %950 = vrot.lane.b32.xlu0 %v947_v24, %s1557_s30 }
 0x27e   : > { %v1095_v29 = vpack.c.bf16 %v1093_v26, %v1093_v26 }
 0x27f   : > { %v1077_v30 = vpop.permute.xlu0 %1076  ;;  %v647_v32 = vpop.permute.xlu1 %646 }
 0x280   : > { %v1079_v31 = vadd.f32 %v1077_v30, %v1066_v27  ;;  %1100 = vrot.lane.b32.xlu1 %v1095_v29, %s1558_s13 }
 0x282   : > { %v1094_v33 = vpack.c.bf16 %v1079_v31, %v1079_v31 }
 0x283   : > { %v651_v34 = vpop.permute.xlu0 %650  ;;  %v633_v41 = vpop.permute.xlu1 %632 }
 0x284   : > { %v653_v36 = vsel %vm639_vm3, %v647_v32, %v651_v34  ;;  %1097 = vrot.lane.b32.xlu0 %v1094_v33, %s1558_s13 }
 0x285   : > { %v654_v38 = vmul.f32 %v653_v36, %v1733_v42 }
 0x287   : > { %v655_v39 = vadd.f32 %v654_v38, %v643_v37  ;;  %v637_v43 = vpop.permute.xlu0 %636 }
 0x288   : > { %v640_v44 = vsel %vm639_vm3, %v633_v41, %v637_v43 }
 0x289   : > { %v657_v45 = vpack.c.bf16 %v655_v39, %v655_v39  ;;  %v641_v46 = vmul.f32 %v640_v44, %v1733_v42 }
 0x28b   : > { %v663_v48 = vsel %vm658_vm4, %v657_v45, 0  ;;  %v642_v49 = vadd.f32 %v641_v46, %v629_v47 }
 0x28c   : > { %1436 = vmatpush3.bf16.xpose.msra.mxu1 %v663_v48 }
 0x28d   : > { %1447 = vmatprep.subr.bf16.mxu1 %v1546_v5  ;;  %v656_v21 = vpack.c.bf16 %v642_v49, %v642_v49 }
 0x293   : > { %1438 = vmatmul.mubr.msk.bf16.vlgmr.msra.gmra.mxu1 %vm658_vm4, %v656_v21 }
 0x294   : > { %1449 = vmatprep.mubr.msk.bf16.mxu1 %vm1547_vm1, %v1546_v5 }
 0x2d8   : > { %v806_v50 = vpop.permute.xlu1 %805 }
 0x2d9   : > { %v811_v51 = vsel %vm658_vm4, %v806_v50, 0 }
 0x2da   : > { %1448 = vmatpush3.bf16.xpose.msra.mxu1 %v811_v51 }
 0x2db   : > { %1459 = vmatprep.subr.bf16.mxu1 %v1546_v5 }
 0x2e6   : > { %v803_v42 = vpop.permute.xlu0 %802 }
 0x2e7   : > { %1450 = vmatmul.mubr.msk.bf16.vlgmr.msra.gmra.mxu1 %vm658_vm4, %v803_v42 }
 0x2e8   : > { %1461 = vmatprep.mubr.msk.bf16.mxu1 %vm1547_vm1, %v1546_v5 }
 0x2ea   : > { %v954_v28 = vpop.permute.xlu1 %953 }
 0x2eb   : > { %v959_v40 = vsel %vm658_vm4, %v954_v28, 0 }
 0x2ec   : > { %1460 = vmatpush3.bf16.xpose.msra.mxu1 %v959_v40 }
 0x2ed   : > { %1471 = vmatprep.subr.bf16.mxu1 %v1546_v5 }
 0x2ee   : > { %v951_v52 = vpop.permute.xlu0 %950 }
 0x2f2   : > { %v1101_v53 = vpop.permute.xlu1 %1100 }
 0x2f3   : > { %v1106_v54 = vsel %vm658_vm4, %v1101_v53, 0  ;;  %1462 = vmatmul.mubr.msk.bf16.vlgmr.msra.gmra.mxu1 %vm658_vm4, %v951_v52 }
 0x2f4   : > { %1472 = vmatpush3.bf16.xpose.msra.mxu1 %v1106_v54  ;;  %1473 = vmatprep.mubr.msk.bf16.mxu1 %vm1547_vm1, %v1546_v5 }
 0x2f5   : > { %1483 = vmatprep.subr.bf16.mxu1 %v1546_v5 }
 0x2f6   : > { %v1098_v55 = vpop.permute.xlu0 %1097 }
 0x2fb   : > { %1474 = vmatmul.mubr.msk.bf16.vlgmr.msra.gmra.mxu1 %vm658_vm4, %v1098_v55 }
 0x2fc   : > { %1487 = vmatprep.mubr.msk.bf16.mxu1 %vm1547_vm1, %v1546_v5 }
 0x353   : > { %v699_v59 = vpop.f32.mrf.mxu1 }
 0x354   : > { %v705_v60 = vmul.f32 0.35355338, %v699_v59 }
 0x355   : > { %v1439_v61 = vpop.f32.mrf.mxu1 }
 0x356   : > { %v706_v62 = vsel %vm628_vm5, %v705_v60, -inf }
 0x357   : > { %v702_v63 = vpop.f32.mrf.mxu1  ;;  %v707_v1 = vsel %vm658_vm4, %v706_v62, -inf }
 0x358   : > { %708 = vmax.xlane.f32.xlu1 %v707_v1 }
 0x359   : > { %v1440_v2 = vpop.f32.mrf.mxu1 }
 0x3a7   : > { %v847_v3 = vpop.f32.mrf.mxu1 }
 0x3a8   : > { %v853_v4 = vmul.f32 0.35355338, %v847_v3 }
 0x3a9   : > { %v1451_v6 = vpop.f32.mrf.mxu1 }
 0x3aa   : > { %v854_v7 = vsel %vm628_vm5, %v853_v4, -inf }
 0x3ab   : > { %v850_v8 = vpop.f32.mrf.mxu1  ;;  %v855_v9 = vsel %vm658_vm4, %v854_v7, -inf }
 0x3ac   : > { %856 = vmax.xlane.f32.xlu0 %v855_v9  ;;  %v1518_v9 = vld [vmem:[%s1863_s5 + $0x8] sm:$0xff]  }
 0x3ad   : > { %v1452_v10 = vpop.f32.mrf.mxu1  ;;  %1484 = vmatpush3.bf16.msra.mxu1 %v1518_v9 }
 0x3ae   : > { %1485 = vmatprep.subr.bf16.mxu1 %v1546_v5 }
 0x3b3   : > { %v995_v11 = vpop.f32.mrf.mxu1 }
 0x3b4   : > { %v1001_v12 = vmul.f32 0.35355338, %v995_v11  ;;  %v1519_v11 = vld [vmem:[%s1863_s5] sm:$0xff]  }
 0x3b5   : > { %v1463_v13 = vpop.f32.mrf.mxu1  ;;  %1486 = vmatpush3.bf16.msra.mxu1 %v1519_v11 }
 0x3b6   : > { %v1002_v14 = vsel %vm628_vm5, %v1001_v12, -inf }
 0x3b7   : > { %v998_v15 = vpop.f32.mrf.mxu1  ;;  %v1003_v16 = vsel %vm658_vm4, %v1002_v14, -inf }
 0x3b8   : > { %1004 = vmax.xlane.f32.xlu0 %v1003_v16 }
 0x3b9   : > { %v1464_v17 = vpop.f32.mrf.mxu1 }
 0x3bb   : > { %v1142_v18 = vpop.f32.mrf.mxu1 }
 0x3bc   : > { %v1148_v19 = vmul.f32 0.35355338, %v1142_v18 }
 0x3bd   : > { %v1475_v20 = vpop.f32.mrf.mxu1 }
 0x3be   : > { %v1149_v22 = vsel %vm628_vm5, %v1148_v19, -inf }
 0x3bf   : > { %v1145_v23 = vpop.f32.mrf.mxu1  ;;  %v1150_v24 = vsel %vm658_vm4, %v1149_v22, -inf }
 0x3c0   : > { %1151 = vmax.xlane.f32.xlu1 %v1150_v24 }
 0x3c1   : > { %v1476_v25 = vpop.f32.mrf.mxu1 }
 0x3e1   : > { %v709_v26 = vpop.xlane.xlu1 %708 }
 0x3e2   : > { %v710_v27 = vsub.f32 %v706_v62, %v709_v26 }
 0x3e4   : > { %v711_v29 = vmul.f32 1.442695, %v710_v27 }
 0x3e6   : > { %1522 = vpow2.f32 %v711_v29 }
 0x3f3   : > { %v1523_v30 = vpop.eup %1522 }
 0x3f4   : > { %v713_v31 = vsel %vm658_vm4, %v1523_v30, 0.0 }
 0x3f5   : > { %714 = vadd.xlane.f32.xlu0 %v713_v31  ;;  %v1377_v31 = vld [vmem:[%s1867_s9] ss:$0 sm:$0xff] }
 0x435   : > { %v857_v32 = vpop.xlane.xlu0 %856 }
 0x436   : > { %v858_v33 = vsub.f32 %v854_v7, %v857_v32 }
 0x438   : > { %v859_v34 = vmul.f32 1.442695, %v858_v33 }
 0x43a   : > { %1524 = vpow2.f32 %v859_v34 }
 0x441   : > { %v1005_v36 = vpop.xlane.xlu0 %1004 }
 0x442   : > { %v1006_v37 = vsub.f32 %v1002_v14, %v1005_v36 }
 0x444   : > { %v1007_v38 = vmul.f32 1.442695, %v1006_v37 }
 0x446   : > { %1526 = vpow2.f32 %v1007_v38 }
 0x447   : > { %v1525_v39 = vpop.eup %1524 }
 0x448   : > { %v861_v41 = vsel %vm658_vm4, %v1525_v39, 0.0 }
 0x449   : > { %862 = vadd.xlane.f32.xlu1 %v861_v41  ;;  %v1152_v45 = vpop.xlane.xlu1 %1151 }
 0x44a   : > { %v1153_v46 = vsub.f32 %v1149_v22, %v1152_v45 }
 0x44c   : > { %v1154_v47 = vmul.f32 1.442695, %v1153_v46 }
 0x44e   : > { %1528 = vpow2.f32 %v1154_v47 }
 0x453   : > { %v1527_v43 = vpop.eup %1526 }
 0x454   : > { %v1009_v44 = vsel %vm658_vm4, %v1527_v43, 0.0 }
 0x455   : > { %1010 = vadd.xlane.f32.xlu0 %v1009_v44 }
 0x45a   : > { %1015 = vrot.lane.b32.xlu1 %v1710_v35, %s1557_s30 }
 0x45b   : > { %v1529_v48 = vpop.eup %1528 }
 0x45c   : > { %v1156_v49 = vsel %vm658_vm4, %v1529_v48, 0.0 }
 0x46b   : > { %868 = vrot.lane.b32.xlu0 %v1710_v35, %s1556_s29 }
 0x47e   : > { %v715_v21 = vpop.xlane.xlu0 %714  ;;  %1157 = vadd.xlane.f32.xlu1 %v1156_v49 }
 0x47f   : > { %1530 = vrcp.f32 %v715_v21 }
 0x48c   : > { %v1531_v50 = vpop.eup %1530 }
 0x48d   : > { %v717_v51 = vmul.f32 %v1531_v50, %v1523_v30 }
 0x48f   : > { %1162 = vrot.lane.b32.xlu1 %v1710_v35, %s1558_s13  ;;  %v718_v42 = vpack.c.bf16 %v717_v51, %v717_v51 }
 0x491   : > { %1444 = vmatmul.mubr.msk.bf16.vlgmr.msra.gmra.mxu0 %vm658_vm4, %v718_v42 }
 0x492   : > { %1455 = vmatprep.mubr.msk.bf16.mxu0 %vm1547_vm1, %v1546_v5 }
 0x4d2   : > { %v863_v28 = vpop.xlane.xlu1 %862 }
 0x4d3   : > { %1532 = vrcp.f32 %v863_v28 }
 0x4d6   : > { %v1016_v56 = vpop.permute.xlu1 %1015 }
 0x4d7   : > { %v1021_v35 = vsel %vm723_vm2, %v1016_v56, 0 }
 0x4de   : > { %v1011_v40 = vpop.xlane.xlu0 %1010 }
 0x4df   : > { %1534 = vrcp.f32 %v1011_v40 }
 0x4e0   : > { %v1533_v52 = vpop.eup %1532 }
 0x4e1   : > { %v865_v53 = vmul.f32 %v1533_v52, %v1525_v39 }
 0x4e2   : > { %v869_v54 = vpop.permute.xlu0 %868 }
 0x4e3   : > { %v874_v55 = vsel %vm723_vm2, %v869_v54, 0  ;;  %v866_v57 = vpack.c.bf16 %v865_v53, %v865_v53 }
 0x4e4   : > { %1454 = vmatpush3.bf16.msra.mxu0 %v874_v55 }
 0x4e5   : > { %1465 = vmatprep.subr.bf16.mxu0 %v1546_v5 }
 0x4e7   : > { %1456 = vmatmul.mubr.msk.bf16.vlgmr.msra.gmra.mxu0 %vm658_vm4, %v866_v57 }
 0x4e8   : > { %1466 = vmatpush3.bf16.msra.mxu0 %v1021_v35  ;;  %1467 = vmatprep.mubr.msk.bf16.mxu0 %vm1547_vm1, %v1546_v5 }
 0x4e9   : > { %1477 = vmatprep.subr.bf16.mxu0 %v1546_v5 }
 0x4ec   : > { %v1535_v58 = vpop.eup %1534 }
 0x4ed   : > { %v1013_v59 = vmul.f32 %v1535_v58, %v1527_v43 }
 0x4ef   : > { %v1014_v60 = vpack.c.bf16 %v1013_v59, %v1013_v59 }
 0x4f1   : > { %1468 = vmatmul.mubr.msk.bf16.vlgmr.msra.gmra.mxu0 %vm658_vm4, %v1014_v60 }
 0x4f2   : > { %1479 = vmatprep.mubr.msk.bf16.mxu0 %vm1547_vm1, %v1546_v5 }
 0x507   : > { %v1158_v61 = vpop.xlane.xlu1 %1157 }
 0x508   : > { %1536 = vrcp.f32 %v1158_v61 }
 0x50b   : > { %v1163_v62 = vpop.permute.xlu1 %1162 }
 0x50c   : > { %v1168_v63 = vsel %vm723_vm2, %v1163_v62, 0 }
 0x50d   : > { %1478 = vmatpush3.bf16.msra.mxu0 %v1168_v63 }
 0x515   : > { %v1537_v1 = vpop.eup %1536 }
 0x516   : > { %v1160_v2 = vmul.f32 %v1537_v1, %v1529_v48 }
 0x518   : > { %v1161_v3 = vpack.c.bf16 %v1160_v2, %v1160_v2 }
 0x51a   : > { %1480 = vmatmul.mubr.msk.bf16.vlgmr.msra.gmra.mxu0 %vm658_vm4, %v1161_v3 }
 0x551   : > { %v761_v4 = vpop.f32.mrf.mxu0 }
 0x553   : > { %v1445_v6 = vpop.f32.mrf.mxu0 }
 0x555   : > { %v764_v7 = vpop.f32.mrf.mxu0 }
 0x557   : > { %v1446_v8 = vpop.f32.mrf.mxu0 }
 0x5a7   : > { %v910_v10 = vpop.f32.mrf.mxu0 }
 0x5a8   : > { %1211 = vrot.lane.b32.xlu0 %v910_v10, %s1551_s19 }
 0x5a9   : > { %v1457_v12 = vpop.f32.mrf.mxu0 }
 0x5ab   : > { %v913_v13 = vpop.f32.mrf.mxu0 }
 0x5ad   : > { %v1458_v14 = vpop.f32.mrf.mxu0 }
 0x5b1   : > { %v1057_v15 = vpop.f32.mrf.mxu0 }
 0x5b2   : > { %1215 = vrot.lane.b32.xlu1 %v1057_v15, %s1552_s20 }
 0x5b3   : > { %v1469_v16 = vpop.f32.mrf.mxu0 }
 0x5b5   : > { %v1060_v17 = vpop.f32.mrf.mxu0 }
 0x5b7   : > { %v1470_v18 = vpop.f32.mrf.mxu0 }
 0x5da   : > { %v1204_v19 = vpop.f32.mrf.mxu0 }
 0x5db   : > { %1219 = vrot.lane.b32.xlu0 %v1204_v19, %s1554_s27 }
 0x5dc   : > { %v1481_v20 = vpop.f32.mrf.mxu0 }
 0x5de   : > { %v1207_v22 = vpop.f32.mrf.mxu0 }
 0x5e0   : > { %v1482_v23 = vpop.f32.mrf.mxu0 }
 0x61a   : > { %v1212_v24 = vpop.permute.xlu0 %1211 }
 0x61b   : > { %v1222_v25 = vsel %vm658_vm4, %v761_v4, %v1212_v24 }
 0x624   : > { %v1216_v5 = vpop.permute.xlu1 %1215 }
 0x625   : > { %v1224_v26 = vsel %vm1223_vm6, %v1222_v25, %v1216_v5 }
 0x64d   : > { %v1220_v27 = vpop.permute.xlu0 %1219 }
 0x64e   : > { %v1226_v29 = vsel %vm1225_vm7, %v1224_v26, %v1220_v27 }
 0x64f   : > { %v1227_v30 = vpack.c.bf16 %v1226_v29, %v1226_v29 }
 0x651   : > { %1488 = vmatmul.mubr.msk.bf16.vlgmr.msra.gmra.mxu1 %vm412_vm0, %v1227_v30 }
 0x711   : > { %v1288_v32 = vpop.f32.mrf.mxu1 }
 0x712   : > { %v1289_v33 = vadd.f32 %v1377_v31, %v1288_v32 }
 0x713   : > { %v1489_v34 = vpop.f32.mrf.mxu1 }
 0x714   : > { %v1294_v36 = vadd.f32 %v1289_v33, %v1640_v0 }
 0x715   : > { %v1291_v37 = vpop.f32.mrf.mxu1 }
 0x716   : > { %1295 = vst.msk [vmem:[%s408_s25] sm:$0xff] %vm412_vm0, %v1294_v36 }
 0x717   : > { %v1490_v38 = vpop.f32.mrf.mxu1 }
 0x718 PF: > { %s22_s21 = sadd.s32 1, %s1544_s21  }
 0x719   : > { %p19_p4 = scmp.ge.s32.totalorder %s22_s21, 4  }
 0x71b   :  { %21 = sbr.rel (!%p19_p4) target bundleno = 1 (0x1), region = 98 }

</bundles_post_ra>
